<compile_context>
chip_gen: v7x
topology: tpu7x:2x2x1
jax: 0.10.0
libtpu: 0.0.40
codegen_flags: <defaults>
</compile_context>

<pallas_src>
import numpy as np
import jax
import jax.numpy as jnp
from jax.experimental import pallas as pl
from jax.experimental.pallas import tpu as pltpu


GW = 128          # lane width of one packed gate block (r | z | n)
PW = 3 * GW       # packed parameter-buffer width (384 lanes)

_VMEM = pl.BlockSpec(memory_space=pltpu.MemorySpace.VMEM)


def _round8(n):
    return -(-n // 8) * 8


def _param_layout(input_size, hidden_size, num_layers):
    """Static row offsets of every section inside the single packed buffer."""
    H = hidden_size
    offs = {}
    row = 0

    def add(name, nrows):
        nonlocal row
        offs[name] = (row, nrows)
        row += _round8(nrows)

    for l in range(num_layers):
        d_in = input_size if l == 0 else 2 * H
        add(f"wA{l}", d_in)      # fwd-direction input weights (natural time)
        add(f"wB{l}", d_in)      # bwd-direction input weights (reversed time)
        add(f"whh{l}", 2 * H)    # both directions' hidden weights, gate-blocked
        add(f"bx{l}", 1)         # folded input-side biases (all gates, both dirs)
        add(f"bhn{l}", 1)        # hidden n-gate bias (kept inside the r* term)
    add("w1", 2 * H)
    add("b1", 1)
    add("w2", 2 * H)
    add("b2", 1)
    return offs, row


# ----------------------------------------------------------------------------
# Fused forward kernel
# ----------------------------------------------------------------------------
def make_fused_kernel(input_size, hidden_size, num_layers, seq_len):
    H = hidden_size
    T = seq_len
    offs, _ = _param_layout(input_size, hidden_size, num_layers)
    f32 = jnp.float32

    def kernel(x_ref, h_ref, p_ref, o_ref):
        # In-kernel batch-0 selection + cast (removes wrapper-side XLA ops).
        x = x_ref[0].astype(f32)                 # (T, D_in)
        h0 = h_ref[:, 0, :].astype(f32)          # (2L, H)

        lanes = jax.lax.broadcasted_iota(jnp.int32, (1, 2 * H), 1)
        fwd_mask = lanes < H                     # lanes 0:H = fwd, H:2H = bwd

        def sect(name, ncols=None):
            r0, nrows = offs[name]
            if ncols is None:
                return p_ref[r0:r0 + nrows, :]
            return p_ref[r0:r0 + nrows, 0:ncols]

        # Layer-0 inputs: natural and time-reversed views of the sequence.
        x_nat = x
        x_rev = jnp.concatenate([x[T - 1 - t:T - t, :] for t in range(T)], axis=0)

        carries = None
        for l in range(num_layers):
            wA = sect(f"wA{l}")                  # (D_l, 384) fwd-gate columns
            wB = sect(f"wB{l}")                  # (D_l, 384) bwd-gate columns
            whh = sect(f"whh{l}")                # (2H, 384)
            bx = sect(f"bx{l}")                  # (1, 384)
            bhn = sect(f"bhn{l}", 2 * H)         # (1, 2H)

            # Step-aligned input pre-activations for ALL T steps, both
            # directions, all 3 gates (two wide matmuls, before the recurrence).
            # Row s columns: [r | z | n] * 128 lanes; fwd units (time s) at
            # 0:H of each block, bwd units (time T-1-s) at H:2H.
            xg = (jnp.dot(x_nat, wA, preferred_element_type=f32)
                  + jnp.dot(x_rev, wB, preferred_element_type=f32) + bx)

            # Combined carry: lanes 0:H = h_fwd, H:2H = h_bwd.
            h = jnp.concatenate([h0[2 * l:2 * l + 1, :],
                                 h0[2 * l + 1:2 * l + 2, :]], axis=1)

            carries = []
            for s in range(T):                   # fully unrolled (T static)
                row = xg[s:s + 1, :]                                   # (1, 384)
                hg = jnp.dot(h, whh, preferred_element_type=f32)       # (1, 384)
                rz = jax.nn.sigmoid(row[:, 0:2 * GW] + hg[:, 0:2 * GW])
                r = rz[:, 0:2 * H]                                     # both dirs
                z = rz[:, GW:GW + 2 * H]
                n = jnp.tanh(row[:, 2 * GW:2 * GW + 2 * H]
                             + r * (hg[:, 2 * GW:2 * GW + 2 * H] + bhn))
                h = n + z * (h - n)              # (1-z)*n + z*h, both dirs
                carries.append(h)

            if l + 1 < num_layers:
                # Next layer input at time t = [y_f[t] | y_b[t]]:
                # y_f[t] = carries[t][0:H], y_b[t] = carries[T-1-t][H:2H].
                rows = [jnp.where(fwd_mask, carries[t], carries[T - 1 - t])
                        for t in range(T)]
                x_nat = jnp.concatenate(rows, axis=0)                  # (T, 2H)
                x_rev = jnp.concatenate(rows[::-1], axis=0)            # (T, 2H)

        # ---- MLP head on outputs[0][-1] == [y_f[T-1] | y_b[T-1]] ----
        hsel = jnp.where(fwd_mask, carries[T - 1], carries[0])         # (1, 2H)
        w1 = sect("w1", 2 * H)
        b1 = sect("b1", 2 * H)
        w2 = sect("w2", 2)
        b2 = sect("b2", 2)
        h1 = jnp.maximum(jnp.dot(hsel, w1, preferred_element_type=f32) + b1, 0.0)
        logits = jnp.maximum(jnp.dot(h1, w2, preferred_element_type=f32) + b2, 0.0)
        m = jnp.max(logits, axis=-1, keepdims=True)     # LogSoftmax over 2 logits
        sh = logits - m
        o_ref[...] = sh - jnp.log(jnp.sum(jnp.exp(sh), axis=-1, keepdims=True))

    return kernel


# ----------------------------------------------------------------------------
# Wrapper
# ----------------------------------------------------------------------------
def binary_classifier_forward(packed_buf, seq, hidden):
    """seq: (B, T, input_size) batch_first; hidden: (num_layers*2, B, H)."""
    _, T, input_size = seq.shape
    two_l, _, H = hidden.shape
    L = two_l // 2
    kernel = make_fused_kernel(input_size, H, L, T)
    logp = pl.pallas_call(
        kernel,
        out_shape=jax.ShapeDtypeStruct((1, 2), jnp.float32),
        in_specs=[_VMEM, _VMEM, _VMEM],
        out_specs=_VMEM,
    )(seq, hidden, packed_buf)
    return logp[0]   # (2,) log-probabilities (matches the 1-D PyTorch output)


forward_jit = jax.jit(binary_classifier_forward)


# ----------------------------------------------------------------------------
# Parameter init (PyTorch-style uniform(-1/sqrt(H), 1/sqrt(H)))
# Gate order along the 3H axis is [r | z | n]; math orientation (x @ W).
# ----------------------------------------------------------------------------
def init_params(key, input_size, hidden_size, num_layers):
    H = hidden_size
    scale = 1.0 / float(H) ** 0.5
    params = {"gru": []}
    k = key
    for layer in range(num_layers):
        in_dim = input_size if layer == 0 else 2 * H
        layer_p = []
        for _direction in range(2):
            k, k1, k2, k3, k4 = jax.random.split(k, 5)
            w_ih = jax.random.uniform(k1, (in_dim, 3 * H), jnp.float32, -scale, scale)
            w_hh = jax.random.uniform(k2, (H, 3 * H), jnp.float32, -scale, scale)
            b_ih = jax.random.uniform(k3, (1, 3 * H), jnp.float32, -scale, scale)
            b_hh = jax.random.uniform(k4, (1, 3 * H), jnp.float32, -scale, scale)
            layer_p.append((w_ih, w_hh, b_ih, b_hh))
        params["gru"].append(layer_p)
    s1 = 1.0 / float(2 * H) ** 0.5
    k, k1, k2, k3, k4 = jax.random.split(k, 5)
    params["w1"] = jax.random.uniform(k1, (2 * H, 2 * H), jnp.float32, -s1, s1)
    params["b1"] = jax.random.uniform(k2, (1, 2 * H), jnp.float32, -s1, s1)
    params["w2"] = jax.random.uniform(k3, (2 * H, 2), jnp.float32, -s1, s1)
    params["b2"] = jax.random.uniform(k4, (1, 2), jnp.float32, -s1, s1)
    return params


# ----------------------------------------------------------------------------
# Offline packing: everything into ONE (rows, 384) f32 buffer, lane-aligned.
# ----------------------------------------------------------------------------
def pack_params(params):
    gru = params["gru"]
    L = len(gru)
    input_size = int(gru[0][0][0].shape[0])
    H = int(gru[0][0][1].shape[0])
    offs, total_rows = _param_layout(input_size, H, L)
    buf = np.zeros((total_rows, PW), np.float32)

    for l, (f, b) in enumerate(gru):
        wfi, wfh, bfi, bfh = [np.asarray(a, np.float32) for a in f]
        wbi, wbh, bbi, bbh = [np.asarray(a, np.float32) for a in b]
        d_in = wfi.shape[0]
        rA, _ = offs[f"wA{l}"]
        rB, _ = offs[f"wB{l}"]
        rH, _ = offs[f"whh{l}"]
        rbx, _ = offs[f"bx{l}"]
        rbn, _ = offs[f"bhn{l}"]
        for g in range(3):                     # r, z, n gate blocks
            c0 = g * GW
            buf[rA:rA + d_in, c0:c0 + H] = wfi[:, g * H:(g + 1) * H]
            buf[rB:rB + d_in, c0 + H:c0 + 2 * H] = wbi[:, g * H:(g + 1) * H]
            buf[rH:rH + H, c0:c0 + H] = wfh[:, g * H:(g + 1) * H]
            buf[rH + H:rH + 2 * H, c0 + H:c0 + 2 * H] = wbh[:, g * H:(g + 1) * H]
            if g < 2:   # r, z: fold b_ih + b_hh into the input-side bias
                buf[rbx, c0:c0 + H] = bfi[0, g * H:(g + 1) * H] + bfh[0, g * H:(g + 1) * H]
                buf[rbx, c0 + H:c0 + 2 * H] = bbi[0, g * H:(g + 1) * H] + bbh[0, g * H:(g + 1) * H]
            else:       # n: only b_ih folded; b_hn stays inside the r* term
                buf[rbx, c0:c0 + H] = bfi[0, g * H:(g + 1) * H]
                buf[rbx, c0 + H:c0 + 2 * H] = bbi[0, g * H:(g + 1) * H]
        buf[rbn, 0:H] = bfh[0, 2 * H:3 * H]
        buf[rbn, H:2 * H] = bbh[0, 2 * H:3 * H]

    r1, _ = offs["w1"]
    rb1, _ = offs["b1"]
    r2, _ = offs["w2"]
    rb2, _ = offs["b2"]
    buf[r1:r1 + 2 * H, 0:2 * H] = np.asarray(params["w1"], np.float32)
    buf[rb1, 0:2 * H] = np.asarray(params["b1"], np.float32)[0]
    buf[r2:r2 + 2 * H, 0:2] = np.asarray(params["w2"], np.float32)
    buf[rb2, 0:2] = np.asarray(params["b2"], np.float32)[0]
    return jnp.asarray(buf)


# ----------------------------------------------------------------------------
# Pure-JAX reference (mirrors the PyTorch forward exactly) for a sanity check
# ----------------------------------------------------------------------------
def _ref_gru_dir(x, w_ih, w_hh, b_ih, b_hh, h0):
    H = w_hh.shape[0]

    def step(h, xt):
        xg = xt @ w_ih + b_ih[0]
        hg = h @ w_hh + b_hh[0]
        r = jax.nn.sigmoid(xg[:H] + hg[:H])
        z = jax.nn.sigmoid(xg[H:2 * H] + hg[H:2 * H])
        n = jnp.tanh(xg[2 * H:] + r * hg[2 * H:])
        hn = (1.0 - z) * n + z * h
        return hn, hn

    _, ys = jax.lax.scan(step, h0, x)
    return ys


def ref_forward(params, seq, hidden):
    x = seq[0]
    for l, (f, b) in enumerate(params["gru"]):
        yf = _ref_gru_dir(x, *f, hidden[2 * l, 0])
        yb = _ref_gru_dir(x[::-1], *b, hidden[2 * l + 1, 0])[::-1]
        x = jnp.concatenate([yf, yb], axis=-1)
    out = x[-1]
    h1 = jax.nn.relu(out @ params["w1"] + params["b1"][0])
    logits = jax.nn.relu(h1 @ params["w2"] + params["b2"][0])
    return jax.nn.log_softmax(logits, axis=-1)


# ----------------------------------------------------------------------------
if __name__ == "__main__":
    input_size, hidden_size, num_layers = 16, 32, 2
    B, T = 1, 8   # init_hidden() implies batch = 1

    key = jax.random.PRNGKey(0)
    k_params, k_seq = jax.random.split(key)
    params = init_params(k_params, input_size, hidden_size, num_layers)
    packed = pack_params(params)

    seq = jax.random.normal(k_seq, (B, T, input_size), dtype=jnp.float32)
    hidden = jnp.zeros((num_layers * 2, B, hidden_size), dtype=jnp.float32)  # init_hidden()

    out = forward_jit(packed, seq, hidden)
    out = jax.block_until_ready(out)

    assert out.shape == (2,)
    assert bool(jnp.isfinite(out).all())
    # log-probabilities must sum to 1 after exp
    assert abs(float(jnp.exp(out).sum()) - 1.0) < 1e-5

    # numerical check against a pure-JAX reference of the same forward pass
    ref = ref_forward(params, seq, hidden)
    assert bool(jnp.allclose(out, ref, atol=1e-2, rtol=1e-2)), (out, ref)

    print("KERNEL_OK")
</pallas_src>

<mosaic_0001>
module attributes {stable_mosaic.version = 11 : i64} {
  func.func @kernel(%arg0: memref<1x8x16xf32, #tpu.memory_space<vmem>>, %arg1: memref<4x1x32xf32, #tpu.memory_space<vmem>>, %arg2: memref<464x384xf32, #tpu.memory_space<vmem>>, %arg3: memref<1x2xf32, #tpu.memory_space<vmem>>) attributes {dimension_semantics = [], scalar_prefetch = 0 : i64, scratch_operands = 0 : i64, tpu.core_type = #tpu.core_type<tc>} {
    %c0 = arith.constant 0 : index
    %c0_0 = arith.constant 0 : index
    %c0_1 = arith.constant 0 : index
    %0 = vector.load %arg0[%c0, %c0_0, %c0_1] : memref<1x8x16xf32, #tpu.memory_space<vmem>>, vector<1x8x16xf32>
    %1 = vector.shape_cast %0 : vector<1x8x16xf32> to vector<8x16xf32>
    %c0_2 = arith.constant 0 : index
    %c0_3 = arith.constant 0 : index
    %c0_4 = arith.constant 0 : index
    %2 = vector.load %arg1[%c0_2, %c0_3, %c0_4] : memref<4x1x32xf32, #tpu.memory_space<vmem>>, vector<4x1x32xf32>
    %3 = vector.shape_cast %2 : vector<4x1x32xf32> to vector<4x32xf32>
    %4 = tpu.iota {dimensions = array<i32: 1>} : vector<1x64xi32>
    %c32_i32 = arith.constant 32 : i32
    %5 = vector.broadcast %c32_i32 : i32 to vector<1x64xi32>
    %6 = arith.cmpi slt, %4, %5 : vector<1x64xi32>
    %7 = vector.extract_strided_slice %1 {offsets = [7, 0], sizes = [1, 16], strides = [1, 1]} : vector<8x16xf32> to vector<1x16xf32>
    %8 = vector.extract_strided_slice %1 {offsets = [6, 0], sizes = [1, 16], strides = [1, 1]} : vector<8x16xf32> to vector<1x16xf32>
    %9 = vector.extract_strided_slice %1 {offsets = [5, 0], sizes = [1, 16], strides = [1, 1]} : vector<8x16xf32> to vector<1x16xf32>
    %10 = vector.extract_strided_slice %1 {offsets = [4, 0], sizes = [1, 16], strides = [1, 1]} : vector<8x16xf32> to vector<1x16xf32>
    %11 = vector.extract_strided_slice %1 {offsets = [3, 0], sizes = [1, 16], strides = [1, 1]} : vector<8x16xf32> to vector<1x16xf32>
    %12 = vector.extract_strided_slice %1 {offsets = [2, 0], sizes = [1, 16], strides = [1, 1]} : vector<8x16xf32> to vector<1x16xf32>
    %13 = vector.extract_strided_slice %1 {offsets = [1, 0], sizes = [1, 16], strides = [1, 1]} : vector<8x16xf32> to vector<1x16xf32>
    %14 = vector.extract_strided_slice %1 {offsets = [0, 0], sizes = [1, 16], strides = [1, 1]} : vector<8x16xf32> to vector<1x16xf32>
    %15 = tpu.concatenate %7, %8, %9, %10, %11, %12, %13, %14 in 0 : vector<1x16xf32>, vector<1x16xf32>, vector<1x16xf32>, vector<1x16xf32>, vector<1x16xf32>, vector<1x16xf32>, vector<1x16xf32>, vector<1x16xf32> -> vector<8x16xf32>
    %c0_5 = arith.constant 0 : index
    %c0_6 = arith.constant 0 : index
    %16 = vector.load %arg2[%c0_5, %c0_6] : memref<464x384xf32, #tpu.memory_space<vmem>>, vector<16x384xf32>
    %c16 = arith.constant 16 : index
    %c0_7 = arith.constant 0 : index
    %17 = vector.load %arg2[%c16, %c0_7] : memref<464x384xf32, #tpu.memory_space<vmem>>, vector<16x384xf32>
    %c32 = arith.constant 32 : index
    %c0_8 = arith.constant 0 : index
    %18 = vector.load %arg2[%c32, %c0_8] : memref<464x384xf32, #tpu.memory_space<vmem>>, vector<64x384xf32>
    %c96 = arith.constant 96 : index
    %c0_9 = arith.constant 0 : index
    %19 = vector.load %arg2[%c96, %c0_9] : memref<464x384xf32, #tpu.memory_space<vmem>>, vector<1x384xf32>
    %c104 = arith.constant 104 : index
    %c0_10 = arith.constant 0 : index
    %20 = vector.load %arg2[%c104, %c0_10] : memref<464x384xf32, #tpu.memory_space<vmem>>, vector<1x64xf32>
    %cst = arith.constant dense<0.000000e+00> : vector<8x384xf32>
    %21 = tpu.matmul %1, %16, %cst {dimension_numbers = #tpu.dot_dimension_numbers<[1], [0], [0], [1], [0, 0, 1, 1], [], []>} : vector<8x16xf32>, vector<16x384xf32>, vector<8x384xf32> -> vector<8x384xf32>
    %cst_11 = arith.constant dense<0.000000e+00> : vector<8x384xf32>
    %22 = tpu.matmul %15, %17, %cst_11 {dimension_numbers = #tpu.dot_dimension_numbers<[1], [0], [0], [1], [0, 0, 1, 1], [], []>} : vector<8x16xf32>, vector<16x384xf32>, vector<8x384xf32> -> vector<8x384xf32>
    %23 = arith.addf %21, %22 : vector<8x384xf32>
    %24 = vector.broadcast %19 : vector<1x384xf32> to vector<8x384xf32>
    %25 = arith.addf %23, %24 : vector<8x384xf32>
    %26 = vector.extract_strided_slice %3 {offsets = [0, 0], sizes = [1, 32], strides = [1, 1]} : vector<4x32xf32> to vector<1x32xf32>
    %27 = vector.extract_strided_slice %3 {offsets = [1, 0], sizes = [1, 32], strides = [1, 1]} : vector<4x32xf32> to vector<1x32xf32>
    %28 = tpu.concatenate %26, %27 in 1 : vector<1x32xf32>, vector<1x32xf32> -> vector<1x64xf32>
    %29 = vector.extract_strided_slice %25 {offsets = [0, 0], sizes = [1, 384], strides = [1, 1]} : vector<8x384xf32> to vector<1x384xf32>
    %cst_12 = arith.constant dense<0.000000e+00> : vector<1x384xf32>
    %30 = tpu.matmul %28, %18, %cst_12 {dimension_numbers = #tpu.dot_dimension_numbers<[1], [0], [0], [1], [0, 0, 1, 1], [], []>} : vector<1x64xf32>, vector<64x384xf32>, vector<1x384xf32> -> vector<1x384xf32>
    %31 = vector.extract_strided_slice %29 {offsets = [0, 0], sizes = [1, 256], strides = [1, 1]} : vector<1x384xf32> to vector<1x256xf32>
    %32 = vector.extract_strided_slice %30 {offsets = [0, 0], sizes = [1, 256], strides = [1, 1]} : vector<1x384xf32> to vector<1x256xf32>
    %33 = arith.addf %31, %32 : vector<1x256xf32>
    %34 = arith.negf %33 : vector<1x256xf32>
    %35 = math.exp %34 : vector<1x256xf32>
    %cst_13 = arith.constant 1.000000e+00 : f32
    %36 = vector.broadcast %cst_13 : f32 to vector<1x256xf32>
    %37 = arith.addf %36, %35 : vector<1x256xf32>
    %38 = arith.divf %36, %37 : vector<1x256xf32>
    %39 = vector.extract_strided_slice %38 {offsets = [0, 0], sizes = [1, 64], strides = [1, 1]} : vector<1x256xf32> to vector<1x64xf32>
    %40 = vector.extract_strided_slice %38 {offsets = [0, 128], sizes = [1, 64], strides = [1, 1]} : vector<1x256xf32> to vector<1x64xf32>
    %41 = vector.extract_strided_slice %29 {offsets = [0, 256], sizes = [1, 64], strides = [1, 1]} : vector<1x384xf32> to vector<1x64xf32>
    %42 = vector.extract_strided_slice %30 {offsets = [0, 256], sizes = [1, 64], strides = [1, 1]} : vector<1x384xf32> to vector<1x64xf32>
    %43 = arith.addf %42, %20 : vector<1x64xf32>
    %44 = arith.mulf %39, %43 : vector<1x64xf32>
    %45 = arith.addf %41, %44 : vector<1x64xf32>
    %46 = math.tanh %45 : vector<1x64xf32>
    %47 = arith.subf %28, %46 : vector<1x64xf32>
    %48 = arith.mulf %40, %47 : vector<1x64xf32>
    %49 = arith.addf %46, %48 : vector<1x64xf32>
    %50 = vector.extract_strided_slice %25 {offsets = [1, 0], sizes = [1, 384], strides = [1, 1]} : vector<8x384xf32> to vector<1x384xf32>
    %cst_14 = arith.constant dense<0.000000e+00> : vector<1x384xf32>
    %51 = tpu.matmul %49, %18, %cst_14 {dimension_numbers = #tpu.dot_dimension_numbers<[1], [0], [0], [1], [0, 0, 1, 1], [], []>} : vector<1x64xf32>, vector<64x384xf32>, vector<1x384xf32> -> vector<1x384xf32>
    %52 = vector.extract_strided_slice %50 {offsets = [0, 0], sizes = [1, 256], strides = [1, 1]} : vector<1x384xf32> to vector<1x256xf32>
    %53 = vector.extract_strided_slice %51 {offsets = [0, 0], sizes = [1, 256], strides = [1, 1]} : vector<1x384xf32> to vector<1x256xf32>
    %54 = arith.addf %52, %53 : vector<1x256xf32>
    %55 = arith.negf %54 : vector<1x256xf32>
    %56 = math.exp %55 : vector<1x256xf32>
    %cst_15 = arith.constant 1.000000e+00 : f32
    %57 = vector.broadcast %cst_15 : f32 to vector<1x256xf32>
    %58 = arith.addf %57, %56 : vector<1x256xf32>
    %59 = arith.divf %57, %58 : vector<1x256xf32>
    %60 = vector.extract_strided_slice %59 {offsets = [0, 0], sizes = [1, 64], strides = [1, 1]} : vector<1x256xf32> to vector<1x64xf32>
    %61 = vector.extract_strided_slice %59 {offsets = [0, 128], sizes = [1, 64], strides = [1, 1]} : vector<1x256xf32> to vector<1x64xf32>
    %62 = vector.extract_strided_slice %50 {offsets = [0, 256], sizes = [1, 64], strides = [1, 1]} : vector<1x384xf32> to vector<1x64xf32>
    %63 = vector.extract_strided_slice %51 {offsets = [0, 256], sizes = [1, 64], strides = [1, 1]} : vector<1x384xf32> to vector<1x64xf32>
    %64 = arith.addf %63, %20 : vector<1x64xf32>
    %65 = arith.mulf %60, %64 : vector<1x64xf32>
    %66 = arith.addf %62, %65 : vector<1x64xf32>
    %67 = math.tanh %66 : vector<1x64xf32>
    %68 = arith.subf %49, %67 : vector<1x64xf32>
    %69 = arith.mulf %61, %68 : vector<1x64xf32>
    %70 = arith.addf %67, %69 : vector<1x64xf32>
    %71 = vector.extract_strided_slice %25 {offsets = [2, 0], sizes = [1, 384], strides = [1, 1]} : vector<8x384xf32> to vector<1x384xf32>
    %cst_16 = arith.constant dense<0.000000e+00> : vector<1x384xf32>
    %72 = tpu.matmul %70, %18, %cst_16 {dimension_numbers = #tpu.dot_dimension_numbers<[1], [0], [0], [1], [0, 0, 1, 1], [], []>} : vector<1x64xf32>, vector<64x384xf32>, vector<1x384xf32> -> vector<1x384xf32>
    %73 = vector.extract_strided_slice %71 {offsets = [0, 0], sizes = [1, 256], strides = [1, 1]} : vector<1x384xf32> to vector<1x256xf32>
    %74 = vector.extract_strided_slice %72 {offsets = [0, 0], sizes = [1, 256], strides = [1, 1]} : vector<1x384xf32> to vector<1x256xf32>
    %75 = arith.addf %73, %74 : vector<1x256xf32>
    %76 = arith.negf %75 : vector<1x256xf32>
    %77 = math.exp %76 : vector<1x256xf32>
    %cst_17 = arith.constant 1.000000e+00 : f32
    %78 = vector.broadcast %cst_17 : f32 to vector<1x256xf32>
    %79 = arith.addf %78, %77 : vector<1x256xf32>
    %80 = arith.divf %78, %79 : vector<1x256xf32>
    %81 = vector.extract_strided_slice %80 {offsets = [0, 0], sizes = [1, 64], strides = [1, 1]} : vector<1x256xf32> to vector<1x64xf32>
    %82 = vector.extract_strided_slice %80 {offsets = [0, 128], sizes = [1, 64], strides = [1, 1]} : vector<1x256xf32> to vector<1x64xf32>
    %83 = vector.extract_strided_slice %71 {offsets = [0, 256], sizes = [1, 64], strides = [1, 1]} : vector<1x384xf32> to vector<1x64xf32>
    %84 = vector.extract_strided_slice %72 {offsets = [0, 256], sizes = [1, 64], strides = [1, 1]} : vector<1x384xf32> to vector<1x64xf32>
    %85 = arith.addf %84, %20 : vector<1x64xf32>
    %86 = arith.mulf %81, %85 : vector<1x64xf32>
    %87 = arith.addf %83, %86 : vector<1x64xf32>
    %88 = math.tanh %87 : vector<1x64xf32>
    %89 = arith.subf %70, %88 : vector<1x64xf32>
    %90 = arith.mulf %82, %89 : vector<1x64xf32>
    %91 = arith.addf %88, %90 : vector<1x64xf32>
    %92 = vector.extract_strided_slice %25 {offsets = [3, 0], sizes = [1, 384], strides = [1, 1]} : vector<8x384xf32> to vector<1x384xf32>
    %cst_18 = arith.constant dense<0.000000e+00> : vector<1x384xf32>
    %93 = tpu.matmul %91, %18, %cst_18 {dimension_numbers = #tpu.dot_dimension_numbers<[1], [0], [0], [1], [0, 0, 1, 1], [], []>} : vector<1x64xf32>, vector<64x384xf32>, vector<1x384xf32> -> vector<1x384xf32>
    %94 = vector.extract_strided_slice %92 {offsets = [0, 0], sizes = [1, 256], strides = [1, 1]} : vector<1x384xf32> to vector<1x256xf32>
    %95 = vector.extract_strided_slice %93 {offsets = [0, 0], sizes = [1, 256], strides = [1, 1]} : vector<1x384xf32> to vector<1x256xf32>
    %96 = arith.addf %94, %95 : vector<1x256xf32>
    %97 = arith.negf %96 : vector<1x256xf32>
    %98 = math.exp %97 : vector<1x256xf32>
    %cst_19 = arith.constant 1.000000e+00 : f32
    %99 = vector.broadcast %cst_19 : f32 to vector<1x256xf32>
    %100 = arith.addf %99, %98 : vector<1x256xf32>
    %101 = arith.divf %99, %100 : vector<1x256xf32>
    %102 = vector.extract_strided_slice %101 {offsets = [0, 0], sizes = [1, 64], strides = [1, 1]} : vector<1x256xf32> to vector<1x64xf32>
    %103 = vector.extract_strided_slice %101 {offsets = [0, 128], sizes = [1, 64], strides = [1, 1]} : vector<1x256xf32> to vector<1x64xf32>
    %104 = vector.extract_strided_slice %92 {offsets = [0, 256], sizes = [1, 64], strides = [1, 1]} : vector<1x384xf32> to vector<1x64xf32>
    %105 = vector.extract_strided_slice %93 {offsets = [0, 256], sizes = [1, 64], strides = [1, 1]} : vector<1x384xf32> to vector<1x64xf32>
    %106 = arith.addf %105, %20 : vector<1x64xf32>
    %107 = arith.mulf %102, %106 : vector<1x64xf32>
    %108 = arith.addf %104, %107 : vector<1x64xf32>
    %109 = math.tanh %108 : vector<1x64xf32>
    %110 = arith.subf %91, %109 : vector<1x64xf32>
    %111 = arith.mulf %103, %110 : vector<1x64xf32>
    %112 = arith.addf %109, %111 : vector<1x64xf32>
    %113 = vector.extract_strided_slice %25 {offsets = [4, 0], sizes = [1, 384], strides = [1, 1]} : vector<8x384xf32> to vector<1x384xf32>
    %cst_20 = arith.constant dense<0.000000e+00> : vector<1x384xf32>
    %114 = tpu.matmul %112, %18, %cst_20 {dimension_numbers = #tpu.dot_dimension_numbers<[1], [0], [0], [1], [0, 0, 1, 1], [], []>} : vector<1x64xf32>, vector<64x384xf32>, vector<1x384xf32> -> vector<1x384xf32>
    %115 = vector.extract_strided_slice %113 {offsets = [0, 0], sizes = [1, 256], strides = [1, 1]} : vector<1x384xf32> to vector<1x256xf32>
    %116 = vector.extract_strided_slice %114 {offsets = [0, 0], sizes = [1, 256], strides = [1, 1]} : vector<1x384xf32> to vector<1x256xf32>
    %117 = arith.addf %115, %116 : vector<1x256xf32>
    %118 = arith.negf %117 : vector<1x256xf32>
    %119 = math.exp %118 : vector<1x256xf32>
    %cst_21 = arith.constant 1.000000e+00 : f32
    %120 = vector.broadcast %cst_21 : f32 to vector<1x256xf32>
    %121 = arith.addf %120, %119 : vector<1x256xf32>
    %122 = arith.divf %120, %121 : vector<1x256xf32>
    %123 = vector.extract_strided_slice %122 {offsets = [0, 0], sizes = [1, 64], strides = [1, 1]} : vector<1x256xf32> to vector<1x64xf32>
    %124 = vector.extract_strided_slice %122 {offsets = [0, 128], sizes = [1, 64], strides = [1, 1]} : vector<1x256xf32> to vector<1x64xf32>
    %125 = vector.extract_strided_slice %113 {offsets = [0, 256], sizes = [1, 64], strides = [1, 1]} : vector<1x384xf32> to vector<1x64xf32>
    %126 = vector.extract_strided_slice %114 {offsets = [0, 256], sizes = [1, 64], strides = [1, 1]} : vector<1x384xf32> to vector<1x64xf32>
    %127 = arith.addf %126, %20 : vector<1x64xf32>
    %128 = arith.mulf %123, %127 : vector<1x64xf32>
    %129 = arith.addf %125, %128 : vector<1x64xf32>
    %130 = math.tanh %129 : vector<1x64xf32>
    %131 = arith.subf %112, %130 : vector<1x64xf32>
    %132 = arith.mulf %124, %131 : vector<1x64xf32>
    %133 = arith.addf %130, %132 : vector<1x64xf32>
    %134 = vector.extract_strided_slice %25 {offsets = [5, 0], sizes = [1, 384], strides = [1, 1]} : vector<8x384xf32> to vector<1x384xf32>
    %cst_22 = arith.constant dense<0.000000e+00> : vector<1x384xf32>
    %135 = tpu.matmul %133, %18, %cst_22 {dimension_numbers = #tpu.dot_dimension_numbers<[1], [0], [0], [1], [0, 0, 1, 1], [], []>} : vector<1x64xf32>, vector<64x384xf32>, vector<1x384xf32> -> vector<1x384xf32>
    %136 = vector.extract_strided_slice %134 {offsets = [0, 0], sizes = [1, 256], strides = [1, 1]} : vector<1x384xf32> to vector<1x256xf32>
    %137 = vector.extract_strided_slice %135 {offsets = [0, 0], sizes = [1, 256], strides = [1, 1]} : vector<1x384xf32> to vector<1x256xf32>
    %138 = arith.addf %136, %137 : vector<1x256xf32>
    %139 = arith.negf %138 : vector<1x256xf32>
    %140 = math.exp %139 : vector<1x256xf32>
    %cst_23 = arith.constant 1.000000e+00 : f32
    %141 = vector.broadcast %cst_23 : f32 to vector<1x256xf32>
    %142 = arith.addf %141, %140 : vector<1x256xf32>
    %143 = arith.divf %141, %142 : vector<1x256xf32>
    %144 = vector.extract_strided_slice %143 {offsets = [0, 0], sizes = [1, 64], strides = [1, 1]} : vector<1x256xf32> to vector<1x64xf32>
    %145 = vector.extract_strided_slice %143 {offsets = [0, 128], sizes = [1, 64], strides = [1, 1]} : vector<1x256xf32> to vector<1x64xf32>
    %146 = vector.extract_strided_slice %134 {offsets = [0, 256], sizes = [1, 64], strides = [1, 1]} : vector<1x384xf32> to vector<1x64xf32>
    %147 = vector.extract_strided_slice %135 {offsets = [0, 256], sizes = [1, 64], strides = [1, 1]} : vector<1x384xf32> to vector<1x64xf32>
    %148 = arith.addf %147, %20 : vector<1x64xf32>
    %149 = arith.mulf %144, %148 : vector<1x64xf32>
    %150 = arith.addf %146, %149 : vector<1x64xf32>
    %151 = math.tanh %150 : vector<1x64xf32>
    %152 = arith.subf %133, %151 : vector<1x64xf32>
    %153 = arith.mulf %145, %152 : vector<1x64xf32>
    %154 = arith.addf %151, %153 : vector<1x64xf32>
    %155 = vector.extract_strided_slice %25 {offsets = [6, 0], sizes = [1, 384], strides = [1, 1]} : vector<8x384xf32> to vector<1x384xf32>
    %cst_24 = arith.constant dense<0.000000e+00> : vector<1x384xf32>
    %156 = tpu.matmul %154, %18, %cst_24 {dimension_numbers = #tpu.dot_dimension_numbers<[1], [0], [0], [1], [0, 0, 1, 1], [], []>} : vector<1x64xf32>, vector<64x384xf32>, vector<1x384xf32> -> vector<1x384xf32>
    %157 = vector.extract_strided_slice %155 {offsets = [0, 0], sizes = [1, 256], strides = [1, 1]} : vector<1x384xf32> to vector<1x256xf32>
    %158 = vector.extract_strided_slice %156 {offsets = [0, 0], sizes = [1, 256], strides = [1, 1]} : vector<1x384xf32> to vector<1x256xf32>
    %159 = arith.addf %157, %158 : vector<1x256xf32>
    %160 = arith.negf %159 : vector<1x256xf32>
    %161 = math.exp %160 : vector<1x256xf32>
    %cst_25 = arith.constant 1.000000e+00 : f32
    %162 = vector.broadcast %cst_25 : f32 to vector<1x256xf32>
    %163 = arith.addf %162, %161 : vector<1x256xf32>
    %164 = arith.divf %162, %163 : vector<1x256xf32>
    %165 = vector.extract_strided_slice %164 {offsets = [0, 0], sizes = [1, 64], strides = [1, 1]} : vector<1x256xf32> to vector<1x64xf32>
    %166 = vector.extract_strided_slice %164 {offsets = [0, 128], sizes = [1, 64], strides = [1, 1]} : vector<1x256xf32> to vector<1x64xf32>
    %167 = vector.extract_strided_slice %155 {offsets = [0, 256], sizes = [1, 64], strides = [1, 1]} : vector<1x384xf32> to vector<1x64xf32>
    %168 = vector.extract_strided_slice %156 {offsets = [0, 256], sizes = [1, 64], strides = [1, 1]} : vector<1x384xf32> to vector<1x64xf32>
    %169 = arith.addf %168, %20 : vector<1x64xf32>
    %170 = arith.mulf %165, %169 : vector<1x64xf32>
    %171 = arith.addf %167, %170 : vector<1x64xf32>
    %172 = math.tanh %171 : vector<1x64xf32>
    %173 = arith.subf %154, %172 : vector<1x64xf32>
    %174 = arith.mulf %166, %173 : vector<1x64xf32>
    %175 = arith.addf %172, %174 : vector<1x64xf32>
    %176 = vector.extract_strided_slice %25 {offsets = [7, 0], sizes = [1, 384], strides = [1, 1]} : vector<8x384xf32> to vector<1x384xf32>
    %cst_26 = arith.constant dense<0.000000e+00> : vector<1x384xf32>
    %177 = tpu.matmul %175, %18, %cst_26 {dimension_numbers = #tpu.dot_dimension_numbers<[1], [0], [0], [1], [0, 0, 1, 1], [], []>} : vector<1x64xf32>, vector<64x384xf32>, vector<1x384xf32> -> vector<1x384xf32>
    %178 = vector.extract_strided_slice %176 {offsets = [0, 0], sizes = [1, 256], strides = [1, 1]} : vector<1x384xf32> to vector<1x256xf32>
    %179 = vector.extract_strided_slice %177 {offsets = [0, 0], sizes = [1, 256], strides = [1, 1]} : vector<1x384xf32> to vector<1x256xf32>
    %180 = arith.addf %178, %179 : vector<1x256xf32>
    %181 = arith.negf %180 : vector<1x256xf32>
    %182 = math.exp %181 : vector<1x256xf32>
    %cst_27 = arith.constant 1.000000e+00 : f32
    %183 = vector.broadcast %cst_27 : f32 to vector<1x256xf32>
    %184 = arith.addf %183, %182 : vector<1x256xf32>
    %185 = arith.divf %183, %184 : vector<1x256xf32>
    %186 = vector.extract_strided_slice %185 {offsets = [0, 0], sizes = [1, 64], strides = [1, 1]} : vector<1x256xf32> to vector<1x64xf32>
    %187 = vector.extract_strided_slice %185 {offsets = [0, 128], sizes = [1, 64], strides = [1, 1]} : vector<1x256xf32> to vector<1x64xf32>
    %188 = vector.extract_strided_slice %176 {offsets = [0, 256], sizes = [1, 64], strides = [1, 1]} : vector<1x384xf32> to vector<1x64xf32>
    %189 = vector.extract_strided_slice %177 {offsets = [0, 256], sizes = [1, 64], strides = [1, 1]} : vector<1x384xf32> to vector<1x64xf32>
    %190 = arith.addf %189, %20 : vector<1x64xf32>
    %191 = arith.mulf %186, %190 : vector<1x64xf32>
    %192 = arith.addf %188, %191 : vector<1x64xf32>
    %193 = math.tanh %192 : vector<1x64xf32>
    %194 = arith.subf %175, %193 : vector<1x64xf32>
    %195 = arith.mulf %187, %194 : vector<1x64xf32>
    %196 = arith.addf %193, %195 : vector<1x64xf32>
    %197 = arith.select %6, %49, %196 : vector<1x64xi1>, vector<1x64xf32>
    %198 = arith.select %6, %70, %175 : vector<1x64xi1>, vector<1x64xf32>
    %199 = arith.select %6, %91, %154 : vector<1x64xi1>, vector<1x64xf32>
    %200 = arith.select %6, %112, %133 : vector<1x64xi1>, vector<1x64xf32>
    %201 = arith.select %6, %133, %112 : vector<1x64xi1>, vector<1x64xf32>
    %202 = arith.select %6, %154, %91 : vector<1x64xi1>, vector<1x64xf32>
    %203 = arith.select %6, %175, %70 : vector<1x64xi1>, vector<1x64xf32>
    %204 = arith.select %6, %196, %49 : vector<1x64xi1>, vector<1x64xf32>
    %205 = tpu.concatenate %197, %198, %199, %200, %201, %202, %203, %204 in 0 : vector<1x64xf32>, vector<1x64xf32>, vector<1x64xf32>, vector<1x64xf32>, vector<1x64xf32>, vector<1x64xf32>, vector<1x64xf32>, vector<1x64xf32> -> vector<8x64xf32>
    %206 = tpu.concatenate %204, %203, %202, %201, %200, %199, %198, %197 in 0 : vector<1x64xf32>, vector<1x64xf32>, vector<1x64xf32>, vector<1x64xf32>, vector<1x64xf32>, vector<1x64xf32>, vector<1x64xf32>, vector<1x64xf32> -> vector<8x64xf32>
    %c112 = arith.constant 112 : index
    %c0_28 = arith.constant 0 : index
    %207 = vector.load %arg2[%c112, %c0_28] : memref<464x384xf32, #tpu.memory_space<vmem>>, vector<64x384xf32>
    %c176 = arith.constant 176 : index
    %c0_29 = arith.constant 0 : index
    %208 = vector.load %arg2[%c176, %c0_29] : memref<464x384xf32, #tpu.memory_space<vmem>>, vector<64x384xf32>
    %c240 = arith.constant 240 : index
    %c0_30 = arith.constant 0 : index
    %209 = vector.load %arg2[%c240, %c0_30] : memref<464x384xf32, #tpu.memory_space<vmem>>, vector<64x384xf32>
    %c304 = arith.constant 304 : index
    %c0_31 = arith.constant 0 : index
    %210 = vector.load %arg2[%c304, %c0_31] : memref<464x384xf32, #tpu.memory_space<vmem>>, vector<1x384xf32>
    %c312 = arith.constant 312 : index
    %c0_32 = arith.constant 0 : index
    %211 = vector.load %arg2[%c312, %c0_32] : memref<464x384xf32, #tpu.memory_space<vmem>>, vector<1x64xf32>
    %cst_33 = arith.constant dense<0.000000e+00> : vector<8x384xf32>
    %212 = tpu.matmul %205, %207, %cst_33 {dimension_numbers = #tpu.dot_dimension_numbers<[1], [0], [0], [1], [0, 0, 1, 1], [], []>} : vector<8x64xf32>, vector<64x384xf32>, vector<8x384xf32> -> vector<8x384xf32>
    %cst_34 = arith.constant dense<0.000000e+00> : vector<8x384xf32>
    %213 = tpu.matmul %206, %208, %cst_34 {dimension_numbers = #tpu.dot_dimension_numbers<[1], [0], [0], [1], [0, 0, 1, 1], [], []>} : vector<8x64xf32>, vector<64x384xf32>, vector<8x384xf32> -> vector<8x384xf32>
    %214 = arith.addf %212, %213 : vector<8x384xf32>
    %215 = vector.broadcast %210 : vector<1x384xf32> to vector<8x384xf32>
    %216 = arith.addf %214, %215 : vector<8x384xf32>
    %217 = vector.extract_strided_slice %3 {offsets = [2, 0], sizes = [1, 32], strides = [1, 1]} : vector<4x32xf32> to vector<1x32xf32>
    %218 = vector.extract_strided_slice %3 {offsets = [3, 0], sizes = [1, 32], strides = [1, 1]} : vector<4x32xf32> to vector<1x32xf32>
    %219 = tpu.concatenate %217, %218 in 1 : vector<1x32xf32>, vector<1x32xf32> -> vector<1x64xf32>
    %220 = vector.extract_strided_slice %216 {offsets = [0, 0], sizes = [1, 384], strides = [1, 1]} : vector<8x384xf32> to vector<1x384xf32>
    %cst_35 = arith.constant dense<0.000000e+00> : vector<1x384xf32>
    %221 = tpu.matmul %219, %209, %cst_35 {dimension_numbers = #tpu.dot_dimension_numbers<[1], [0], [0], [1], [0, 0, 1, 1], [], []>} : vector<1x64xf32>, vector<64x384xf32>, vector<1x384xf32> -> vector<1x384xf32>
    %222 = vector.extract_strided_slice %220 {offsets = [0, 0], sizes = [1, 256], strides = [1, 1]} : vector<1x384xf32> to vector<1x256xf32>
    %223 = vector.extract_strided_slice %221 {offsets = [0, 0], sizes = [1, 256], strides = [1, 1]} : vector<1x384xf32> to vector<1x256xf32>
    %224 = arith.addf %222, %223 : vector<1x256xf32>
    %225 = arith.negf %224 : vector<1x256xf32>
    %226 = math.exp %225 : vector<1x256xf32>
    %cst_36 = arith.constant 1.000000e+00 : f32
    %227 = vector.broadcast %cst_36 : f32 to vector<1x256xf32>
    %228 = arith.addf %227, %226 : vector<1x256xf32>
    %229 = arith.divf %227, %228 : vector<1x256xf32>
    %230 = vector.extract_strided_slice %229 {offsets = [0, 0], sizes = [1, 64], strides = [1, 1]} : vector<1x256xf32> to vector<1x64xf32>
    %231 = vector.extract_strided_slice %229 {offsets = [0, 128], sizes = [1, 64], strides = [1, 1]} : vector<1x256xf32> to vector<1x64xf32>
    %232 = vector.extract_strided_slice %220 {offsets = [0, 256], sizes = [1, 64], strides = [1, 1]} : vector<1x384xf32> to vector<1x64xf32>
    %233 = vector.extract_strided_slice %221 {offsets = [0, 256], sizes = [1, 64], strides = [1, 1]} : vector<1x384xf32> to vector<1x64xf32>
    %234 = arith.addf %233, %211 : vector<1x64xf32>
    %235 = arith.mulf %230, %234 : vector<1x64xf32>
    %236 = arith.addf %232, %235 : vector<1x64xf32>
    %237 = math.tanh %236 : vector<1x64xf32>
    %238 = arith.subf %219, %237 : vector<1x64xf32>
    %239 = arith.mulf %231, %238 : vector<1x64xf32>
    %240 = arith.addf %237, %239 : vector<1x64xf32>
    %241 = vector.extract_strided_slice %216 {offsets = [1, 0], sizes = [1, 384], strides = [1, 1]} : vector<8x384xf32> to vector<1x384xf32>
    %cst_37 = arith.constant dense<0.000000e+00> : vector<1x384xf32>
    %242 = tpu.matmul %240, %209, %cst_37 {dimension_numbers = #tpu.dot_dimension_numbers<[1], [0], [0], [1], [0, 0, 1, 1], [], []>} : vector<1x64xf32>, vector<64x384xf32>, vector<1x384xf32> -> vector<1x384xf32>
    %243 = vector.extract_strided_slice %241 {offsets = [0, 0], sizes = [1, 256], strides = [1, 1]} : vector<1x384xf32> to vector<1x256xf32>
    %244 = vector.extract_strided_slice %242 {offsets = [0, 0], sizes = [1, 256], strides = [1, 1]} : vector<1x384xf32> to vector<1x256xf32>
    %245 = arith.addf %243, %244 : vector<1x256xf32>
    %246 = arith.negf %245 : vector<1x256xf32>
    %247 = math.exp %246 : vector<1x256xf32>
    %cst_38 = arith.constant 1.000000e+00 : f32
    %248 = vector.broadcast %cst_38 : f32 to vector<1x256xf32>
    %249 = arith.addf %248, %247 : vector<1x256xf32>
    %250 = arith.divf %248, %249 : vector<1x256xf32>
    %251 = vector.extract_strided_slice %250 {offsets = [0, 0], sizes = [1, 64], strides = [1, 1]} : vector<1x256xf32> to vector<1x64xf32>
    %252 = vector.extract_strided_slice %250 {offsets = [0, 128], sizes = [1, 64], strides = [1, 1]} : vector<1x256xf32> to vector<1x64xf32>
    %253 = vector.extract_strided_slice %241 {offsets = [0, 256], sizes = [1, 64], strides = [1, 1]} : vector<1x384xf32> to vector<1x64xf32>
    %254 = vector.extract_strided_slice %242 {offsets = [0, 256], sizes = [1, 64], strides = [1, 1]} : vector<1x384xf32> to vector<1x64xf32>
    %255 = arith.addf %254, %211 : vector<1x64xf32>
    %256 = arith.mulf %251, %255 : vector<1x64xf32>
    %257 = arith.addf %253, %256 : vector<1x64xf32>
    %258 = math.tanh %257 : vector<1x64xf32>
    %259 = arith.subf %240, %258 : vector<1x64xf32>
    %260 = arith.mulf %252, %259 : vector<1x64xf32>
    %261 = arith.addf %258, %260 : vector<1x64xf32>
    %262 = vector.extract_strided_slice %216 {offsets = [2, 0], sizes = [1, 384], strides = [1, 1]} : vector<8x384xf32> to vector<1x384xf32>
    %cst_39 = arith.constant dense<0.000000e+00> : vector<1x384xf32>
    %263 = tpu.matmul %261, %209, %cst_39 {dimension_numbers = #tpu.dot_dimension_numbers<[1], [0], [0], [1], [0, 0, 1, 1], [], []>} : vector<1x64xf32>, vector<64x384xf32>, vector<1x384xf32> -> vector<1x384xf32>
    %264 = vector.extract_strided_slice %262 {offsets = [0, 0], sizes = [1, 256], strides = [1, 1]} : vector<1x384xf32> to vector<1x256xf32>
    %265 = vector.extract_strided_slice %263 {offsets = [0, 0], sizes = [1, 256], strides = [1, 1]} : vector<1x384xf32> to vector<1x256xf32>
    %266 = arith.addf %264, %265 : vector<1x256xf32>
    %267 = arith.negf %266 : vector<1x256xf32>
    %268 = math.exp %267 : vector<1x256xf32>
    %cst_40 = arith.constant 1.000000e+00 : f32
    %269 = vector.broadcast %cst_40 : f32 to vector<1x256xf32>
    %270 = arith.addf %269, %268 : vector<1x256xf32>
    %271 = arith.divf %269, %270 : vector<1x256xf32>
    %272 = vector.extract_strided_slice %271 {offsets = [0, 0], sizes = [1, 64], strides = [1, 1]} : vector<1x256xf32> to vector<1x64xf32>
    %273 = vector.extract_strided_slice %271 {offsets = [0, 128], sizes = [1, 64], strides = [1, 1]} : vector<1x256xf32> to vector<1x64xf32>
    %274 = vector.extract_strided_slice %262 {offsets = [0, 256], sizes = [1, 64], strides = [1, 1]} : vector<1x384xf32> to vector<1x64xf32>
    %275 = vector.extract_strided_slice %263 {offsets = [0, 256], sizes = [1, 64], strides = [1, 1]} : vector<1x384xf32> to vector<1x64xf32>
    %276 = arith.addf %275, %211 : vector<1x64xf32>
    %277 = arith.mulf %272, %276 : vector<1x64xf32>
    %278 = arith.addf %274, %277 : vector<1x64xf32>
    %279 = math.tanh %278 : vector<1x64xf32>
    %280 = arith.subf %261, %279 : vector<1x64xf32>
    %281 = arith.mulf %273, %280 : vector<1x64xf32>
    %282 = arith.addf %279, %281 : vector<1x64xf32>
    %283 = vector.extract_strided_slice %216 {offsets = [3, 0], sizes = [1, 384], strides = [1, 1]} : vector<8x384xf32> to vector<1x384xf32>
    %cst_41 = arith.constant dense<0.000000e+00> : vector<1x384xf32>
    %284 = tpu.matmul %282, %209, %cst_41 {dimension_numbers = #tpu.dot_dimension_numbers<[1], [0], [0], [1], [0, 0, 1, 1], [], []>} : vector<1x64xf32>, vector<64x384xf32>, vector<1x384xf32> -> vector<1x384xf32>
    %285 = vector.extract_strided_slice %283 {offsets = [0, 0], sizes = [1, 256], strides = [1, 1]} : vector<1x384xf32> to vector<1x256xf32>
    %286 = vector.extract_strided_slice %284 {offsets = [0, 0], sizes = [1, 256], strides = [1, 1]} : vector<1x384xf32> to vector<1x256xf32>
    %287 = arith.addf %285, %286 : vector<1x256xf32>
    %288 = arith.negf %287 : vector<1x256xf32>
    %289 = math.exp %288 : vector<1x256xf32>
    %cst_42 = arith.constant 1.000000e+00 : f32
    %290 = vector.broadcast %cst_42 : f32 to vector<1x256xf32>
    %291 = arith.addf %290, %289 : vector<1x256xf32>
    %292 = arith.divf %290, %291 : vector<1x256xf32>
    %293 = vector.extract_strided_slice %292 {offsets = [0, 0], sizes = [1, 64], strides = [1, 1]} : vector<1x256xf32> to vector<1x64xf32>
    %294 = vector.extract_strided_slice %292 {offsets = [0, 128], sizes = [1, 64], strides = [1, 1]} : vector<1x256xf32> to vector<1x64xf32>
    %295 = vector.extract_strided_slice %283 {offsets = [0, 256], sizes = [1, 64], strides = [1, 1]} : vector<1x384xf32> to vector<1x64xf32>
    %296 = vector.extract_strided_slice %284 {offsets = [0, 256], sizes = [1, 64], strides = [1, 1]} : vector<1x384xf32> to vector<1x64xf32>
    %297 = arith.addf %296, %211 : vector<1x64xf32>
    %298 = arith.mulf %293, %297 : vector<1x64xf32>
    %299 = arith.addf %295, %298 : vector<1x64xf32>
    %300 = math.tanh %299 : vector<1x64xf32>
    %301 = arith.subf %282, %300 : vector<1x64xf32>
    %302 = arith.mulf %294, %301 : vector<1x64xf32>
    %303 = arith.addf %300, %302 : vector<1x64xf32>
    %304 = vector.extract_strided_slice %216 {offsets = [4, 0], sizes = [1, 384], strides = [1, 1]} : vector<8x384xf32> to vector<1x384xf32>
    %cst_43 = arith.constant dense<0.000000e+00> : vector<1x384xf32>
    %305 = tpu.matmul %303, %209, %cst_43 {dimension_numbers = #tpu.dot_dimension_numbers<[1], [0], [0], [1], [0, 0, 1, 1], [], []>} : vector<1x64xf32>, vector<64x384xf32>, vector<1x384xf32> -> vector<1x384xf32>
    %306 = vector.extract_strided_slice %304 {offsets = [0, 0], sizes = [1, 256], strides = [1, 1]} : vector<1x384xf32> to vector<1x256xf32>
    %307 = vector.extract_strided_slice %305 {offsets = [0, 0], sizes = [1, 256], strides = [1, 1]} : vector<1x384xf32> to vector<1x256xf32>
    %308 = arith.addf %306, %307 : vector<1x256xf32>
    %309 = arith.negf %308 : vector<1x256xf32>
    %310 = math.exp %309 : vector<1x256xf32>
    %cst_44 = arith.constant 1.000000e+00 : f32
    %311 = vector.broadcast %cst_44 : f32 to vector<1x256xf32>
    %312 = arith.addf %311, %310 : vector<1x256xf32>
    %313 = arith.divf %311, %312 : vector<1x256xf32>
    %314 = vector.extract_strided_slice %313 {offsets = [0, 0], sizes = [1, 64], strides = [1, 1]} : vector<1x256xf32> to vector<1x64xf32>
    %315 = vector.extract_strided_slice %313 {offsets = [0, 128], sizes = [1, 64], strides = [1, 1]} : vector<1x256xf32> to vector<1x64xf32>
    %316 = vector.extract_strided_slice %304 {offsets = [0, 256], sizes = [1, 64], strides = [1, 1]} : vector<1x384xf32> to vector<1x64xf32>
    %317 = vector.extract_strided_slice %305 {offsets = [0, 256], sizes = [1, 64], strides = [1, 1]} : vector<1x384xf32> to vector<1x64xf32>
    %318 = arith.addf %317, %211 : vector<1x64xf32>
    %319 = arith.mulf %314, %318 : vector<1x64xf32>
    %320 = arith.addf %316, %319 : vector<1x64xf32>
    %321 = math.tanh %320 : vector<1x64xf32>
    %322 = arith.subf %303, %321 : vector<1x64xf32>
    %323 = arith.mulf %315, %322 : vector<1x64xf32>
    %324 = arith.addf %321, %323 : vector<1x64xf32>
    %325 = vector.extract_strided_slice %216 {offsets = [5, 0], sizes = [1, 384], strides = [1, 1]} : vector<8x384xf32> to vector<1x384xf32>
    %cst_45 = arith.constant dense<0.000000e+00> : vector<1x384xf32>
    %326 = tpu.matmul %324, %209, %cst_45 {dimension_numbers = #tpu.dot_dimension_numbers<[1], [0], [0], [1], [0, 0, 1, 1], [], []>} : vector<1x64xf32>, vector<64x384xf32>, vector<1x384xf32> -> vector<1x384xf32>
    %327 = vector.extract_strided_slice %325 {offsets = [0, 0], sizes = [1, 256], strides = [1, 1]} : vector<1x384xf32> to vector<1x256xf32>
    %328 = vector.extract_strided_slice %326 {offsets = [0, 0], sizes = [1, 256], strides = [1, 1]} : vector<1x384xf32> to vector<1x256xf32>
    %329 = arith.addf %327, %328 : vector<1x256xf32>
    %330 = arith.negf %329 : vector<1x256xf32>
    %331 = math.exp %330 : vector<1x256xf32>
    %cst_46 = arith.constant 1.000000e+00 : f32
    %332 = vector.broadcast %cst_46 : f32 to vector<1x256xf32>
    %333 = arith.addf %332, %331 : vector<1x256xf32>
    %334 = arith.divf %332, %333 : vector<1x256xf32>
    %335 = vector.extract_strided_slice %334 {offsets = [0, 0], sizes = [1, 64], strides = [1, 1]} : vector<1x256xf32> to vector<1x64xf32>
    %336 = vector.extract_strided_slice %334 {offsets = [0, 128], sizes = [1, 64], strides = [1, 1]} : vector<1x256xf32> to vector<1x64xf32>
    %337 = vector.extract_strided_slice %325 {offsets = [0, 256], sizes = [1, 64], strides = [1, 1]} : vector<1x384xf32> to vector<1x64xf32>
    %338 = vector.extract_strided_slice %326 {offsets = [0, 256], sizes = [1, 64], strides = [1, 1]} : vector<1x384xf32> to vector<1x64xf32>
    %339 = arith.addf %338, %211 : vector<1x64xf32>
    %340 = arith.mulf %335, %339 : vector<1x64xf32>
    %341 = arith.addf %337, %340 : vector<1x64xf32>
    %342 = math.tanh %341 : vector<1x64xf32>
    %343 = arith.subf %324, %342 : vector<1x64xf32>
    %344 = arith.mulf %336, %343 : vector<1x64xf32>
    %345 = arith.addf %342, %344 : vector<1x64xf32>
    %346 = vector.extract_strided_slice %216 {offsets = [6, 0], sizes = [1, 384], strides = [1, 1]} : vector<8x384xf32> to vector<1x384xf32>
    %cst_47 = arith.constant dense<0.000000e+00> : vector<1x384xf32>
    %347 = tpu.matmul %345, %209, %cst_47 {dimension_numbers = #tpu.dot_dimension_numbers<[1], [0], [0], [1], [0, 0, 1, 1], [], []>} : vector<1x64xf32>, vector<64x384xf32>, vector<1x384xf32> -> vector<1x384xf32>
    %348 = vector.extract_strided_slice %346 {offsets = [0, 0], sizes = [1, 256], strides = [1, 1]} : vector<1x384xf32> to vector<1x256xf32>
    %349 = vector.extract_strided_slice %347 {offsets = [0, 0], sizes = [1, 256], strides = [1, 1]} : vector<1x384xf32> to vector<1x256xf32>
    %350 = arith.addf %348, %349 : vector<1x256xf32>
    %351 = arith.negf %350 : vector<1x256xf32>
    %352 = math.exp %351 : vector<1x256xf32>
    %cst_48 = arith.constant 1.000000e+00 : f32
    %353 = vector.broadcast %cst_48 : f32 to vector<1x256xf32>
    %354 = arith.addf %353, %352 : vector<1x256xf32>
    %355 = arith.divf %353, %354 : vector<1x256xf32>
    %356 = vector.extract_strided_slice %355 {offsets = [0, 0], sizes = [1, 64], strides = [1, 1]} : vector<1x256xf32> to vector<1x64xf32>
    %357 = vector.extract_strided_slice %355 {offsets = [0, 128], sizes = [1, 64], strides = [1, 1]} : vector<1x256xf32> to vector<1x64xf32>
    %358 = vector.extract_strided_slice %346 {offsets = [0, 256], sizes = [1, 64], strides = [1, 1]} : vector<1x384xf32> to vector<1x64xf32>
    %359 = vector.extract_strided_slice %347 {offsets = [0, 256], sizes = [1, 64], strides = [1, 1]} : vector<1x384xf32> to vector<1x64xf32>
    %360 = arith.addf %359, %211 : vector<1x64xf32>
    %361 = arith.mulf %356, %360 : vector<1x64xf32>
    %362 = arith.addf %358, %361 : vector<1x64xf32>
    %363 = math.tanh %362 : vector<1x64xf32>
    %364 = arith.subf %345, %363 : vector<1x64xf32>
    %365 = arith.mulf %357, %364 : vector<1x64xf32>
    %366 = arith.addf %363, %365 : vector<1x64xf32>
    %367 = vector.extract_strided_slice %216 {offsets = [7, 0], sizes = [1, 384], strides = [1, 1]} : vector<8x384xf32> to vector<1x384xf32>
    %cst_49 = arith.constant dense<0.000000e+00> : vector<1x384xf32>
    %368 = tpu.matmul %366, %209, %cst_49 {dimension_numbers = #tpu.dot_dimension_numbers<[1], [0], [0], [1], [0, 0, 1, 1], [], []>} : vector<1x64xf32>, vector<64x384xf32>, vector<1x384xf32> -> vector<1x384xf32>
    %369 = vector.extract_strided_slice %367 {offsets = [0, 0], sizes = [1, 256], strides = [1, 1]} : vector<1x384xf32> to vector<1x256xf32>
    %370 = vector.extract_strided_slice %368 {offsets = [0, 0], sizes = [1, 256], strides = [1, 1]} : vector<1x384xf32> to vector<1x256xf32>
    %371 = arith.addf %369, %370 : vector<1x256xf32>
    %372 = arith.negf %371 : vector<1x256xf32>
    %373 = math.exp %372 : vector<1x256xf32>
    %cst_50 = arith.constant 1.000000e+00 : f32
    %374 = vector.broadcast %cst_50 : f32 to vector<1x256xf32>
    %375 = arith.addf %374, %373 : vector<1x256xf32>
    %376 = arith.divf %374, %375 : vector<1x256xf32>
    %377 = vector.extract_strided_slice %376 {offsets = [0, 0], sizes = [1, 64], strides = [1, 1]} : vector<1x256xf32> to vector<1x64xf32>
    %378 = vector.extract_strided_slice %376 {offsets = [0, 128], sizes = [1, 64], strides = [1, 1]} : vector<1x256xf32> to vector<1x64xf32>
    %379 = vector.extract_strided_slice %367 {offsets = [0, 256], sizes = [1, 64], strides = [1, 1]} : vector<1x384xf32> to vector<1x64xf32>
    %380 = vector.extract_strided_slice %368 {offsets = [0, 256], sizes = [1, 64], strides = [1, 1]} : vector<1x384xf32> to vector<1x64xf32>
    %381 = arith.addf %380, %211 : vector<1x64xf32>
    %382 = arith.mulf %377, %381 : vector<1x64xf32>
    %383 = arith.addf %379, %382 : vector<1x64xf32>
    %384 = math.tanh %383 : vector<1x64xf32>
    %385 = arith.subf %366, %384 : vector<1x64xf32>
    %386 = arith.mulf %378, %385 : vector<1x64xf32>
    %387 = arith.addf %384, %386 : vector<1x64xf32>
    %388 = arith.select %6, %387, %240 : vector<1x64xi1>, vector<1x64xf32>
    %c320 = arith.constant 320 : index
    %c0_51 = arith.constant 0 : index
    %389 = vector.load %arg2[%c320, %c0_51] : memref<464x384xf32, #tpu.memory_space<vmem>>, vector<64x64xf32>
    %c384 = arith.constant 384 : index
    %c0_52 = arith.constant 0 : index
    %390 = vector.load %arg2[%c384, %c0_52] : memref<464x384xf32, #tpu.memory_space<vmem>>, vector<1x64xf32>
    %c392 = arith.constant 392 : index
    %c0_53 = arith.constant 0 : index
    %391 = vector.load %arg2[%c392, %c0_53] : memref<464x384xf32, #tpu.memory_space<vmem>>, vector<64x2xf32>
    %c456 = arith.constant 456 : index
    %c0_54 = arith.constant 0 : index
    %392 = vector.load %arg2[%c456, %c0_54] : memref<464x384xf32, #tpu.memory_space<vmem>>, vector<1x2xf32>
    %cst_55 = arith.constant dense<0.000000e+00> : vector<1x64xf32>
    %393 = tpu.matmul %388, %389, %cst_55 {dimension_numbers = #tpu.dot_dimension_numbers<[1], [0], [0], [1], [0, 0, 1, 1], [], []>} : vector<1x64xf32>, vector<64x64xf32>, vector<1x64xf32> -> vector<1x64xf32>
    %394 = arith.addf %393, %390 : vector<1x64xf32>
    %cst_56 = arith.constant 0.000000e+00 : f32
    %395 = vector.broadcast %cst_56 : f32 to vector<1x64xf32>
    %396 = arith.maximumf %394, %395 : vector<1x64xf32>
    %cst_57 = arith.constant dense<0.000000e+00> : vector<1x2xf32>
    %397 = tpu.matmul %396, %391, %cst_57 {dimension_numbers = #tpu.dot_dimension_numbers<[1], [0], [0], [1], [0, 0, 1, 1], [], []>} : vector<1x64xf32>, vector<64x2xf32>, vector<1x2xf32> -> vector<1x2xf32>
    %398 = arith.addf %397, %392 : vector<1x2xf32>
    %cst_58 = arith.constant 0.000000e+00 : f32
    %399 = vector.broadcast %cst_58 : f32 to vector<1x2xf32>
    %400 = arith.maximumf %398, %399 : vector<1x2xf32>
    %cst_59 = arith.constant dense<0xFF800000> : vector<1xf32>
    %401 = vector.multi_reduction <maximumf>, %400, %cst_59 [1] : vector<1x2xf32> to vector<1xf32>
    %402 = vector.shape_cast %401 : vector<1xf32> to vector<1x1xf32>
    %403 = vector.broadcast %402 : vector<1x1xf32> to vector<1x2xf32>
    %404 = arith.subf %400, %403 : vector<1x2xf32>
    %405 = math.exp %404 : vector<1x2xf32>
    %cst_60 = arith.constant dense<0.000000e+00> : vector<1xf32>
    %406 = vector.multi_reduction <add>, %405, %cst_60 [1] : vector<1x2xf32> to vector<1xf32>
    %407 = vector.shape_cast %406 : vector<1xf32> to vector<1x1xf32>
    %408 = math.log %407 : vector<1x1xf32>
    %409 = vector.broadcast %408 : vector<1x1xf32> to vector<1x2xf32>
    %410 = arith.subf %404, %409 : vector<1x2xf32>
    %c0_61 = arith.constant 0 : index
    %c0_62 = arith.constant 0 : index
    %411 = vector.load %arg3[%c0_61, %c0_62] : memref<1x2xf32, #tpu.memory_space<vmem>>, vector<1x2xf32>
    tpu.vector_store %arg3[%c0_61, %c0_62], %410 {strides = array<i32>} : memref<1x2xf32, #tpu.memory_space<vmem>>, vector<1x2xf32>,
    return
  }
}

</mosaic_0001>

<bundles_post_ra>
// kernel: binary_classifier_forward.1
= control target key start
LH: loop header
LB: loop body
LE: loop exit
PB: predicated region body
PF: predicated region fallthrough
CT: control target
= control target key end

     0   :  { %8 = vsyncpa [#allocation3], 0  ;;  %s6139_s0 = inlined_call_operand.hbm [shape: f32[1,8,16], index: 0, kind: input, shape index: {}]   ;;  %s6140_s1 = inlined_call_operand.vmem [shape: f32[4,1,32], index: 1, kind: input, shape index: {}]   ;;  %s6141_s2 = inlined_call_operand.hbm [shape: f32[464,384], index: 2, kind: input, shape index: {}]   ;;  %s6142_s3 = inlined_call_operand.hbm [shape: f32[1,2], index: 3, kind: output, shape index: {}]  }
   0x1   :  { %9 = vsyncpa [#allocation6], 0 }
   0x2   :  { %10 = vsyncpa [#allocation4], 0  ;;  %s5392_s12 = smov [#allocation2]   ;;  %s5393_s14 = smov [#allocation5]  }
   0x3   :  { %s17_s13 = sshll.u32 %s5392_s12, 4  ;;  %s28_s15 = sshll.u32 %s5393_s14, 4  ;;  %s18_s13 = int_to_ptr.vmem [resolvable:$true] %s17_s13  ;;  %s5421_s15 = int_to_ptr.vmem [resolvable:$true] %s28_s15 }
   0x4   :  { %s5320_s18 = scalar_lea.hbm %s6139_s0, 128 }
   0x5   :  { %p5321_p0 = scmp.ne.s32.totalorder %s6139_s0, %s5320_s18  ;;  %p5324_p1 = scmp.lt.u32.totalorder %s5320_s18, %s6139_s0 }
   0x7   :  { %p5326_p2 = pnand %p5324_p1, %p5321_p0 }
   0x9   :  { %5329 = shalt.err (!%p5326_p2)
}
   0xa   :  { %s5330_s23 = scalar_lea.vmem %s18_s13, 128  ;;  %p5335_p4 = scmp.lt.s32.totalorder %s18_s13, %s18_s13 }
   0xb   :  { %p5331_p3 = scmp.ne.s32.totalorder %s18_s13, %s5330_s23  ;;  %p5336_p5 = scmp.lt.s32.totalorder %s5330_s23, %s5330_s23 }
   0xd   :  { %p5337_p6 = por %p5336_p5, %p5335_p4 }
   0xf   :  { %p5338_p7 = pnand %p5337_p6, %p5331_p3 }
  0x11   :  { %5341 = shalt.err (!%p5338_p7)
}
  0x12   :  { %20 = dma.hbm_to_vmem [thread:$0]  %s6139_s0, 128, %s18_s13, [#allocation3]  }
  0x13   :  { %s5342_s28 = scalar_lea.hbm %s6141_s2, 22272 }
  0x14   :  { %p5343_p8 = scmp.ne.s32.totalorder %s6141_s2, %s5342_s28  ;;  %p5346_p9 = scmp.lt.u32.totalorder %s5342_s28, %s6141_s2 }
  0x16   :  { %p5348_p10 = pnand %p5346_p9, %p5343_p8 }
  0x18   :  { %5351 = shalt.err (!%p5348_p10)
}
  0x19   :  { %s5352_s6 = scalar_lea.vmem %s5421_s15, 22272  ;;  %p5357_p12 = scmp.lt.s32.totalorder %s5421_s15, %s5421_s15 }
  0x1a   :  { %p5353_p11 = scmp.ne.s32.totalorder %s5421_s15, %s5352_s6  ;;  %p5358_p13 = scmp.lt.s32.totalorder %s5352_s6, %s5352_s6 }
  0x1c   :  { %p5359_p0 = por %p5358_p13, %p5357_p12 }
  0x1e   :  { %p5360_p1 = pnand %p5359_p0, %p5353_p11 }
  0x20   :  { %5363 = shalt.err (!%p5360_p1)
}
  0x21   :  { %s5394_s0 = smov 384   ;;  %s5395_s7 = smov 24  }
  0x22   :  { %34 = dma.hbm_to_vmem [thread:$0]  %s6141_s2, 22272, %s5421_s15, [#allocation6], %s5394_s0, %s5394_s0, %s5395_s7  }
  0x23   :  { %5386 = dma.done.wait [#allocation3], 128  }
  0x24   :  { %5387 = vsyncadd [#allocation3], 4294967168 }
  0x25   :  { %5388 = dma.done.wait [#allocation6], 22272  }
  0x26   :  { %5389 = vsyncadd [#allocation6], 4294945024  ;;  %v5396_v0 = vmov 0.0   ;;  %v5397_v1 = vmov 0.0|0.0   ;;  %vm5398_vm0 = vmmov 0   ;;  %v79_v3 = vld [vmem:[#allocation5 + $0x38] sm:$0xff] }
  0x27   :  { %179 = vmatprep.mubr.f32.mxu0 %v5396_v0  ;;  %4605 = vmatprep.subr.bf16.mxu1 %v5397_v1  ;;  %v3949_v2 = vld [vmem:[%s6140_s1 + $0x1] ss:$0 sm:$0xff]  ;;  %v82_v4 = vld [vmem:[#allocation5 + $0x50] sm:$0xff]  ;;  %s5399_s2 = smov 32   ;;  %v81_v7 = vld [vmem:[#allocation5 + $0x48] sm:$0xff]  ;;  %vm58_vm1 = vcmask 1040384  }
  0x28   :  { %4211 = vmatprep.mubr.msk.f32.mxu1 %vm5398_vm0, %v5396_v0  ;;  %423 = vrot.lane.b32.xlu0 %v3949_v2, %s5399_s2  ;;  %v4601_v5 = vpack.c.bf16 %v82_v4, %v79_v3  ;;  %v78_v6 = vld [vmem:[#allocation5 + $0x30] sm:$0xff]  ;;  %v5460_v8 = vld [vmem:[#allocation2] sm:$0xff]  ;;  %vm60_vm2 = vcmask 1041408   ;;  %v73_v13 = vld [vmem:[#allocation5 + $0x8] sm:$0xff]  ;;  %vm62_vm3 = vcmask 1042432   ;;  %vm64_vm4 = vcmask 1043456  }
  0x29   :  { %v4603_v9 = vpack.c.bf16 %v81_v7, %v78_v6  ;;  %v50_v10 = vrot.slane %v5460_v8, 7  ;;  %v52_v11 = vrot.slane %v5460_v8, 5  ;;  %v54_v12 = vrot.slane %v5460_v8, 3  ;;  %v76_v14 = vld [vmem:[#allocation5 + $0x20] sm:$0xff]  ;;  %v83_v18 = vld [vmem:[#allocation5 + $0x58] sm:$0xff]  ;;  %v74_v25 = vld [vmem:[#allocation5 + $0x10] sm:$0xff] }
  0x2a   :  { %4602 = vmatprep.subr.bf16.mxu0 %v4601_v5  ;;  %v56_v15 = vrot.slane %v5460_v8, 1  ;;  %v4608_v16 = vpack.c.bf16 %v76_v14, %v73_v13  ;;  %v80_v17 = vld [vmem:[#allocation5 + $0x40] sm:$0xff]  ;;  %vm66_vm5 = vcmask 1044480   ;;  %v75_v23 = vld [vmem:[#allocation5 + $0x18] sm:$0xff]  ;;  %vm68_vm6 = vcmask 1045504   ;;  %v77_v26 = vld [vmem:[#allocation5 + $0x28] sm:$0xff] }
  0x2b   :  { %4604 = vmatpush1.bf16.msra.mxu0 %v4603_v9  ;;  %v59_v19 = vsel %vm58_vm1, %v50_v10, %v52_v11  ;;  %v4606_v20 = vpack.c.bf16 %v83_v18, %v80_v17  ;;  %v72_v22 = vld [vmem:[#allocation5] sm:$0xff]  ;;  %vm70_vm7 = vcmask 1046528   ;;  %v85_v28 = vld [vmem:[#allocation5 + $0x68] sm:$0xff]  ;;  %vm111_vm8 = vcmask 130048   ;;  %v86_v36 = vld [vmem:[#allocation5 + $0x70] sm:$0xff] }
  0x2c   :  { %v61_v21 = vsel %vm60_vm2, %v59_v19, %v54_v12  ;;  %4609 = vmatprep.subr.bf16.mxu0 %v4608_v16  ;;  %v88_v29 = vld [vmem:[#allocation5 + $0x80] sm:$0xff]  ;;  %v4610_v31 = vpack.c.bf16 %v75_v23, %v72_v22  ;;  %v4613_v33 = vpack.c.bf16 %v77_v26, %v74_v25  ;;  %v89_v37 = vld [vmem:[#allocation5 + $0x88] sm:$0xff]  ;;  %v87_v39 = vld [vmem:[#allocation5 + $0x78] sm:$0xff]  ;;  %vm426_vm9 = vcmask 261120  }
  0x2d   :  { %v63_v24 = vsel %vm62_vm3, %v61_v21, %v56_v15  ;;  %4607 = vmatpush3.bf16.msra.mxu1 %v4606_v20  ;;  %v5474_v35 = vpack.c.bf16 %v88_v29, %v85_v28  ;;  %v84_v38 = vld [vmem:[#allocation5 + $0x60] sm:$0xff]  ;;  %v5481_v40 = vpack.c.bf16 %v89_v37, %v86_v36  ;;  %v91_v41 = vld [vmem:[#allocation5 + $0x98] sm:$0xff]  ;;  %v94_v42 = vld [vmem:[#allocation5 + $0xb0] sm:$0xff]  ;;  %vm428_vm10 = vcmask 523264  }
  0x2e   :  { %v65_v27 = vsel %vm64_vm4, %v63_v24, %v50_v10  ;;  %4612 = vmatprep.subr.bf16.mxu1 %v5397_v1  ;;  %v92_v43 = vld [vmem:[#allocation5 + $0xa0] sm:$0xff]  ;;  %v95_v44 = vld [vmem:[#allocation5 + $0xb8] sm:$0xff]  ;;  %v5487_v45 = vpack.c.bf16 %v87_v39, %v84_v38  ;;  %v5490_v46 = vpack.c.bf16 %v94_v42, %v91_v41  ;;  %v90_v47 = vld [vmem:[#allocation5 + $0x90] sm:$0xff]  ;;  %v46_v17 = vlaneseq }
  0x2f   :  { %v67_v30 = vsel %vm66_vm5, %v65_v27, %v52_v11  ;;  %v93_v48 = vld [vmem:[#allocation5 + $0xa8] sm:$0xff]  ;;  %v5492_v49 = vpack.c.bf16 %v95_v44, %v92_v43  ;;  %v100_v51 = vld [vmem:[#allocation5 + $0xe0] sm:$0xff]  ;;  %v98_v52 = vld [vmem:[#allocation5 + $0xd0] sm:$0xff]  ;;  %vm3915_vm12 = vcmask 8192  }
  0x30   :  { %v69_v32 = vsel %vm68_vm6, %v67_v30, %v54_v12  ;;  %v97_v50 = vld [vmem:[#allocation5 + $0xc8] sm:$0xff]  ;;  %v5500_v54 = vpack.c.bf16 %v93_v48, %v90_v47  ;;  %v96_v56 = vld [vmem:[#allocation5 + $0xc0] sm:$0xff]  ;;  %v99_v57 = vld [vmem:[#allocation5 + $0xd8] sm:$0xff]  ;;  %v5558_v18 = vshrl.u32 %v46_v17, 7 }
  0x31   :  { %v71_v34 = vsel %vm70_vm7, %v69_v32, %v56_v15  ;;  %v101_v53 = vld [vmem:[#allocation5 + $0xe8] sm:$0xff]  ;;  %v5505_v55 = vpack.c.bf16 %v100_v51, %v97_v50  ;;  %v103_v59 = vld [vmem:[#allocation5 + $0xf8] sm:$0xff]  ;;  %v106_v60 = vld [vmem:[#allocation5 + $0x110] sm:$0xff]  ;;  %v5511_v63 = vpack.c.bf16 %v99_v57, %v96_v56 }
  0x32   :  { %3945 = vmatmul.mubr.msk.f32.vlgmr.msra.gmra.mrb[0].mxu0 %vm111_vm8, %v71_v34  ;;  %4212 = vmatmul.mubr.msk.f32.vlgmr.msra.gmra.mrb[0].mxu1 %vm111_vm8, %v71_v34  ;;  %v5507_v58 = vpack.c.bf16 %v101_v53, %v98_v52  ;;  %v104_v61 = vld [vmem:[#allocation5 + $0x100] sm:$0xff]  ;;  %v107_v62 = vld [vmem:[#allocation5 + $0x118] sm:$0xff]  ;;  %v5515_v2 = vpack.c.bf16 %v106_v60, %v103_v59  ;;  %v102_v3 = vld [vmem:[#allocation5 + $0xf0] sm:$0xff]  ;;  %v402_v19 = vsub.s32 0, %v5558_v18  ;;  %v406_v23 = vsub.s32 1, %v5558_v18 }
  0x33   :  { %4611 = vmatpush1.bf16.msra.mxu0 %v4610_v31  ;;  %322 = vmatprep.mubr.f32.mxu0 %v5396_v0  ;;  %v105_v4 = vld [vmem:[#allocation5 + $0x108] sm:$0xff]  ;;  %v5517_v5 = vpack.c.bf16 %v107_v62, %v104_v61  ;;  %v42_v7 = vld [vmem:[%s6140_s1] sm:$0x1]  ;;  %v410_v37 = vsub.s32 2, %v5558_v18 }
  0x34   :  { %4614 = vmatpush3.bf16.msra.mxu1 %v4613_v33  ;;  %4218 = vmatprep.mubr.msk.f32.mxu1 %vm5398_vm0, %v5396_v0  ;;  %v5521_v6 = vpack.c.bf16 %v105_v4, %v102_v3  ;;  %v109_v20 = vld [vmem:[#allocation5 + $0x120] ss:$8 sm:$0x7]  ;;  %v5573_v38 = vld [vmem:[#allocation5 + $0x138] ss:$0 sm:$0xff] }
  0x35   :  { %4616 = vmatprep.subr.bf16.mxu0 %v5474_v35  ;;  %4631 = vmatprep.subr.bf16.mxu1 %v5397_v1  ;;  %v403_v21 = vrot.slane %v109_v20, %v402_v19  ;;  %v407_v29 = vrot.slane %v109_v20, %v406_v23  ;;  %v411_v39 = vrot.slane %v109_v20, %v410_v37 }
  0x37   :  { %4219 = vmatmul.mubr.msk.f32.vlgmr.msra.gmra.mrb[2].mxu1 %vm111_vm8, %v5460_v8 }
  0x38   :  { %4633 = vmatpush3.bf16.msra.mxu1 %v5481_v40  ;;  %4237 = vmatprep.mubr.msk.f32.mxu1 %vm5398_vm0, %v5396_v0 }
  0x39   :  { %4634 = vmatprep.subr.bf16.mxu1 %v5397_v1 }
  0x3a   :  { %3947 = vmatmul.mubr.msk.f32.vlgmr.msra.gmra.mrb[0].mxu0 %vm111_vm8, %v5460_v8 }
  0x3b   :  { %4618 = vmatpush1.bf16.msra.mxu0 %v5487_v45  ;;  %496 = vmatprep.mubr.f32.mxu0 %v5396_v0 }
  0x3c   :  { %4620 = vmatprep.subr.bf16.mxu0 %v5490_v46  ;;  %4636 = vmatpush3.bf16.msra.mxu1 %v5492_v49 }
  0x3d   :  { %4637 = vmatprep.subr.bf16.mxu1 %v5397_v1 }
  0x3f   :  { %4622 = vmatpush1.bf16.msra.mxu0 %v5500_v54 }
  0x40   :  { %4624 = vmatprep.subr.bf16.mxu0 %v5505_v55  ;;  %4639 = vmatpush3.bf16.msra.mxu1 %v5507_v58 }
  0x41   :  { %4640 = vmatprep.subr.bf16.mxu1 %v5397_v1 }
  0x43   :  { %4626 = vmatpush1.bf16.msra.mxu0 %v5511_v63 }
  0x44   :  { %4628 = vmatprep.subr.bf16.mxu0 %v5515_v2  ;;  %4642 = vmatpush3.bf16.msra.mxu1 %v5517_v5 }
  0x45   :  { %4659 = vmatprep.subr.bf16.mxu1 %v5397_v1 }
  0x47   :  { %4630 = vmatpush1.bf16.msra.mxu0 %v5521_v6 }
  0x48   :  { %4644 = vmatprep.subr.bf16.mxu0 %v5474_v35 }
  0x9a   :  { %v424_v8 = vpop.permute.xlu0 %423 }
  0x9b   :  { %v5532_v9 = vsel %vm426_vm9, %v42_v7, %v424_v8 }
  0x9c   :  { %3950 = vmatmul.mubr.msk.f32.vlgmr.msra.gmra.mrb[2].mxu0 %vm428_vm10, %v5532_v9  ;;  %4238 = vmatmul.mubr.msk.f32.vlgmr.msra.gmra.mrb[4].mxu1 %vm428_vm10, %v5532_v9 }
  0x9d   :  { %4646 = vmatpush1.bf16.msra.mxu0 %v5487_v45  ;;  %4661 = vmatpush3.bf16.msra.mxu1 %v5481_v40 }
  0x9e   :  { %4648 = vmatprep.subr.bf16.mxu0 %v5490_v46  ;;  %4662 = vmatprep.subr.bf16.mxu1 %v5397_v1 }
  0x9f   :  { %661 = vmatprep.mubr.f32.mxu0 %v5396_v0  ;;  %4256 = vmatprep.mubr.msk.f32.mxu1 %vm5398_vm0, %v5396_v0 }
  0xa1   :  { %4650 = vmatpush1.bf16.msra.mxu0 %v5500_v54  ;;  %4664 = vmatpush3.bf16.msra.mxu1 %v5492_v49 }
  0xa2   :  { %4652 = vmatprep.subr.bf16.mxu0 %v5505_v55  ;;  %4665 = vmatprep.subr.bf16.mxu1 %v5397_v1 }
  0xa5   :  { %4654 = vmatpush1.bf16.msra.mxu0 %v5511_v63  ;;  %4667 = vmatpush3.bf16.msra.mxu1 %v5507_v58 }
  0xa6   :  { %4656 = vmatprep.subr.bf16.mxu0 %v5515_v2  ;;  %4668 = vmatprep.subr.bf16.mxu1 %v5397_v1 }
  0xa9   :  { %4658 = vmatpush1.bf16.msra.mxu0 %v5521_v6  ;;  %4670 = vmatpush3.bf16.msra.mxu1 %v5517_v5 }
  0xaa   :  { %4672 = vmatprep.subr.bf16.mxu0 %v5474_v35  ;;  %4687 = vmatprep.subr.bf16.mxu1 %v5397_v1 }
 0x105   :  { %v252_v10 = vpop.f32.mrb[0].mxu1 }
 0x106   :  { %v4213_v11 = vpop.f32.mrb[1].mxu1 }
 0x10a   :  { %v395_v12 = vpop.f32.mrb[2].mxu1 }
 0x10b   :  { %v396_v13 = vadd.f32 %v395_v12, %v252_v10  ;;  %v4220_v14 = vpop.f32.mrb[3].mxu1 }
 0x10d   :  { %v324_v15 = vpop.f32.mrb[0].mxu0  ;;  %v5578_v44 = vadd.f32 %v411_v39, %v396_v13 }
 0x10e   :  { %v326_v16 = vpop.f32.mrb[1].mxu0  ;;  %v5563_v22 = vadd.f32 %v403_v21, %v324_v15 }
 0x10f   :  { %v5569_v31 = vadd.f32 %v407_v29, %v326_v16 }
 0x16f   :  { %v498_v24 = vpop.f32.mrb[2].mxu0  ;;  %v569_v25 = vpop.f32.mrb[4].mxu1 }
 0x170   :  { %v573_v26 = vadd.f32 %v498_v24, %v5563_v22  ;;  %v500_v27 = vpop.f32.mrb[3].mxu0  ;;  %v4239_v28 = vpop.f32.mrb[5].mxu1  ;;  %v587_v42 = vadd.f32 %v569_v25, %v5573_v38 }
 0x171   :  { %v574_v32 = vadd.f32 %v500_v27, %v5569_v31 }
 0x172   :  { %v3952_v30 = vmul.f32 -1.442695, %v573_v26 }
 0x173   :  { %v3953_v33 = vmul.f32 -1.442695, %v574_v32 }
 0x174   :  { %5156 = vpow2.f32 %v3952_v30 }
 0x175   :  { %5158 = vpow2.f32 %v3953_v33 }
 0x17e   :  { %v5157_v34 = vpop.eup %5156 }
 0x17f   :  { %v581_v36 = vadd.f32 1.0, %v5157_v34  ;;  %v5159_v41 = vpop.eup %5158 }
 0x180   :  { %v582_v50 = vadd.f32 1.0, %v5159_v41 }
 0x181   :  { %5160 = vrcp.f32 %v581_v36 }
 0x18b   :  { %v5161_v43 = vpop.eup %5160 }
 0x18c   :  { %v588_v47 = vmul.f32 %v5161_v43, %v587_v42 }
 0x18e   :  { %v589_v48 = vadd.f32 %v588_v47, %v5578_v44 }
 0x190   :  { %5162 = vtanh.f32 %v589_v48 }
 0x191   :  { %5164 = vrcp.f32 %v582_v50 }
 0x19a   :  { %v5163_v51 = vpop.eup %5162 }
 0x19b   :  { %v591_v52 = vsub.f32 %v5532_v9, %v5163_v51  ;;  %v5165_v53 = vpop.eup %5164 }
 0x19d   :  { %v592_v56 = vmul.f32 %v5165_v53, %v591_v52 }
 0x19f   :  { %v5582_v57 = vadd.f32 %v5163_v51, %v592_v56 }
 0x1a1   :  { %3954 = vmatmul.mubr.msk.f32.vlgmr.msra.gmra.mrb[4].mxu0 %vm428_vm10, %v5582_v57  ;;  %4257 = vmatmul.mubr.msk.f32.vlgmr.msra.gmra.mrb[6].mxu1 %vm428_vm10, %v5582_v57 }
 0x1a2   :  { %4674 = vmatpush1.bf16.msra.mxu0 %v5487_v45  ;;  %4689 = vmatpush3.bf16.msra.mxu1 %v5481_v40 }
 0x1a3   :  { %4676 = vmatprep.subr.bf16.mxu0 %v5490_v46  ;;  %4690 = vmatprep.subr.bf16.mxu1 %v5397_v1 }
 0x1a4   :  { %842 = vmatprep.mubr.f32.mxu0 %v5396_v0  ;;  %4275 = vmatprep.mubr.msk.f32.mxu1 %vm5398_vm0, %v5396_v0 }
 0x1a6   :  { %4678 = vmatpush1.bf16.msra.mxu0 %v5500_v54  ;;  %4692 = vmatpush3.bf16.msra.mxu1 %v5492_v49 }
 0x1a7   :  { %4680 = vmatprep.subr.bf16.mxu0 %v5505_v55  ;;  %4693 = vmatprep.subr.bf16.mxu1 %v5397_v1 }
 0x1aa   :  { %4682 = vmatpush1.bf16.msra.mxu0 %v5511_v63  ;;  %4695 = vmatpush3.bf16.msra.mxu1 %v5507_v58 }
 0x1ab   :  { %4684 = vmatprep.subr.bf16.mxu0 %v5515_v2  ;;  %4696 = vmatprep.subr.bf16.mxu1 %v5397_v1 }
 0x1ae   :  { %4686 = vmatpush1.bf16.msra.mxu0 %v5521_v6  ;;  %4698 = vmatpush3.bf16.msra.mxu1 %v5517_v5 }
 0x1af   :  { %4700 = vmatprep.subr.bf16.mxu0 %v5474_v35  ;;  %4715 = vmatprep.subr.bf16.mxu1 %v5397_v1 }
 0x274   :  { %v663_v59 = vpop.f32.mrb[4].mxu0  ;;  %v734_v60 = vpop.f32.mrb[6].mxu1 }
 0x275   :  { %v740_v61 = vrot.slane %v663_v59, 7  ;;  %v665_v62 = vpop.f32.mrb[5].mxu0  ;;  %v4258_v3 = vpop.f32.mrb[7].mxu1  ;;  %v758_v13 = vadd.f32 %v734_v60, %v5573_v38 }
 0x276   :  { %v741_v8 = vrot.slane %v665_v62, 7 }
 0x277   :  { %v744_v4 = vadd.f32 %v740_v61, %v5563_v22  ;;  %v760_v14 = vrot.slane %v758_v13, 7 }
 0x278   :  { %v745_v9 = vadd.f32 %v741_v8, %v5569_v31 }
 0x279   :  { %v3956_v7 = vmul.f32 -1.442695, %v744_v4 }
 0x27a   :  { %v3957_v12 = vmul.f32 -1.442695, %v745_v9 }
 0x27b   :  { %5166 = vpow2.f32 %v3956_v7 }
 0x285   :  { %v5167_v10 = vpop.eup %5166 }
 0x286   :  { %v752_v11 = vadd.f32 1.0, %v5167_v10 }
 0x288   :  { %5168 = vrcp.f32 %v752_v11 }
 0x289   :  { %5170 = vpow2.f32 %v3957_v12 }
 0x292   :  { %v5169_v15 = vpop.eup %5168 }
 0x293   :  { %v762_v16 = vmul.f32 %v5169_v15, %v760_v14  ;;  %v5171_v21 = vpop.eup %5170 }
 0x294   :  { %v753_v24 = vadd.f32 1.0, %v5171_v21 }
 0x295   :  { %v763_v20 = vadd.f32 %v762_v16, %v5578_v44 }
 0x297   :  { %5172 = vtanh.f32 %v763_v20 }
 0x298   :  { %5174 = vrcp.f32 %v753_v24 }
 0x2a1   :  { %v5173_v25 = vpop.eup %5172 }
 0x2a2   :  { %v766_v26 = vrot.slane %v5173_v25, 1  ;;  %v5175_v29 = vpop.eup %5174 }
 0x2a4   :  { %v768_v27 = vsub.f32 %v5582_v57, %v766_v26 }
 0x2a6   :  { %v770_v28 = vrot.slane %v768_v27, 7 }
 0x2a8   :  { %v772_v30 = vmul.f32 %v5175_v29, %v770_v28 }
 0x2aa   :  { %v5612_v32 = vadd.f32 %v5173_v25, %v772_v30 }
 0x2ac   :  { %v775_v33 = vrot.slane %v5612_v32, 1 }
 0x2ae   :  { %3958 = vmatmul.mubr.msk.f32.vlgmr.msra.gmra.mrb[6].mxu0 %vm428_vm10, %v775_v33  ;;  %4276 = vmatmul.mubr.msk.f32.vlgmr.msra.gmra.mrb[8].mxu1 %vm428_vm10, %v775_v33 }
 0x2af   :  { %4702 = vmatpush1.bf16.msra.mxu0 %v5487_v45  ;;  %4717 = vmatpush3.bf16.msra.mxu1 %v5481_v40 }
 0x2b0   :  { %4704 = vmatprep.subr.bf16.mxu0 %v5490_v46  ;;  %4718 = vmatprep.subr.bf16.mxu1 %v5397_v1 }
 0x2b1   :  { %1023 = vmatprep.mubr.f32.mxu0 %v5396_v0  ;;  %4294 = vmatprep.mubr.msk.f32.mxu1 %vm5398_vm0, %v5396_v0 }
 0x2b3   :  { %4706 = vmatpush1.bf16.msra.mxu0 %v5500_v54  ;;  %4720 = vmatpush3.bf16.msra.mxu1 %v5492_v49 }
 0x2b4   :  { %4708 = vmatprep.subr.bf16.mxu0 %v5505_v55  ;;  %4721 = vmatprep.subr.bf16.mxu1 %v5397_v1 }
 0x2b7   :  { %4710 = vmatpush1.bf16.msra.mxu0 %v5511_v63  ;;  %4723 = vmatpush3.bf16.msra.mxu1 %v5507_v58 }
 0x2b8   :  { %4712 = vmatprep.subr.bf16.mxu0 %v5515_v2  ;;  %4724 = vmatprep.subr.bf16.mxu1 %v5397_v1 }
 0x2bb   :  { %4714 = vmatpush1.bf16.msra.mxu0 %v5521_v6  ;;  %4726 = vmatpush3.bf16.msra.mxu1 %v5517_v5 }
 0x2bc   :  { %4728 = vmatprep.subr.bf16.mxu0 %v5474_v35  ;;  %4743 = vmatprep.subr.bf16.mxu1 %v5397_v1 }
 0x381   :  { %v844_v34 = vpop.f32.mrb[6].mxu0  ;;  %v915_v36 = vpop.f32.mrb[8].mxu1 }
 0x382   :  { %v921_v39 = vrot.slane %v844_v34, 6  ;;  %v846_v41 = vpop.f32.mrb[7].mxu0  ;;  %v4277_v42 = vpop.f32.mrb[9].mxu1  ;;  %v939_v56 = vadd.f32 %v915_v36, %v5573_v38 }
 0x383   :  { %v922_v48 = vrot.slane %v846_v41, 6 }
 0x384   :  { %v925_v43 = vadd.f32 %v921_v39, %v5563_v22  ;;  %v941_v59 = vrot.slane %v939_v56, 6 }
 0x385   :  { %v926_v50 = vadd.f32 %v922_v48, %v5569_v31 }
 0x386   :  { %v3960_v47 = vmul.f32 -1.442695, %v925_v43 }
 0x387   :  { %v3961_v53 = vmul.f32 -1.442695, %v926_v50 }
 0x388   :  { %5176 = vpow2.f32 %v3960_v47 }
 0x392   :  { %v5177_v51 = vpop.eup %5176 }
 0x393   :  { %v933_v52 = vadd.f32 1.0, %v5177_v51 }
 0x395   :  { %5178 = vrcp.f32 %v933_v52 }
 0x396   :  { %5180 = vpow2.f32 %v3961_v53 }
 0x39f   :  { %v5179_v60 = vpop.eup %5178 }
 0x3a0   :  { %v943_v61 = vmul.f32 %v5179_v60, %v941_v59  ;;  %v5181_v3 = vpop.eup %5180 }
 0x3a1   :  { %v934_v4 = vadd.f32 1.0, %v5181_v3 }
 0x3a2   :  { %v944_v62 = vadd.f32 %v943_v61, %v5578_v44 }
 0x3a4   :  { %5182 = vtanh.f32 %v944_v62 }
 0x3a5   :  { %5184 = vrcp.f32 %v934_v4 }
 0x3ae   :  { %v5183_v7 = vpop.eup %5182 }
 0x3af   :  { %v947_v8 = vrot.slane %v5183_v7, 1  ;;  %v5185_v11 = vpop.eup %5184 }
 0x3b1   :  { %v949_v9 = vsub.f32 %v5612_v32, %v947_v8 }
 0x3b3   :  { %v951_v10 = vrot.slane %v949_v9, 7 }
 0x3b5   :  { %v953_v12 = vmul.f32 %v5185_v11, %v951_v10 }
 0x3b7   :  { %v5641_v13 = vadd.f32 %v5183_v7, %v953_v12 }
 0x3b9   :  { %v956_v14 = vrot.slane %v5641_v13, 2 }
 0x3bb   :  { %3962 = vmatmul.mubr.msk.f32.vlgmr.msra.gmra.mrb[8].mxu0 %vm428_vm10, %v956_v14  ;;  %4295 = vmatmul.mubr.msk.f32.vlgmr.msra.gmra.mrb[10].mxu1 %vm428_vm10, %v956_v14 }
 0x3bc   :  { %4730 = vmatpush1.bf16.msra.mxu0 %v5487_v45  ;;  %4745 = vmatpush3.bf16.msra.mxu1 %v5481_v40 }
 0x3bd   :  { %4732 = vmatprep.subr.bf16.mxu0 %v5490_v46  ;;  %4746 = vmatprep.subr.bf16.mxu1 %v5397_v1 }
 0x3be   :  { %1204 = vmatprep.mubr.f32.mxu0 %v5396_v0  ;;  %4313 = vmatprep.mubr.msk.f32.mxu1 %vm5398_vm0, %v5396_v0 }
 0x3c0   :  { %4734 = vmatpush1.bf16.msra.mxu0 %v5500_v54  ;;  %4748 = vmatpush3.bf16.msra.mxu1 %v5492_v49 }
 0x3c1   :  { %4736 = vmatprep.subr.bf16.mxu0 %v5505_v55  ;;  %4749 = vmatprep.subr.bf16.mxu1 %v5397_v1 }
 0x3c4   :  { %4738 = vmatpush1.bf16.msra.mxu0 %v5511_v63  ;;  %4751 = vmatpush3.bf16.msra.mxu1 %v5507_v58 }
 0x3c5   :  { %4740 = vmatprep.subr.bf16.mxu0 %v5515_v2  ;;  %4752 = vmatprep.subr.bf16.mxu1 %v5397_v1 }
 0x3c8   :  { %4742 = vmatpush1.bf16.msra.mxu0 %v5521_v6  ;;  %4754 = vmatpush3.bf16.msra.mxu1 %v5517_v5 }
 0x3c9   :  { %4756 = vmatprep.subr.bf16.mxu0 %v5474_v35  ;;  %4771 = vmatprep.subr.bf16.mxu1 %v5397_v1 }
 0x48e   :  { %v1025_v15 = vpop.f32.mrb[8].mxu0  ;;  %v1096_v16 = vpop.f32.mrb[10].mxu1 }
 0x48f   :  { %v1102_v20 = vrot.slane %v1025_v15, 5  ;;  %v1027_v21 = vpop.f32.mrb[9].mxu0  ;;  %v4296_v24 = vpop.f32.mrb[11].mxu1  ;;  %v1120_v34 = vadd.f32 %v1096_v16, %v5573_v38 }
 0x490   :  { %v1103_v27 = vrot.slane %v1027_v21, 5 }
 0x491   :  { %v1106_v25 = vadd.f32 %v1102_v20, %v5563_v22  ;;  %v1122_v36 = vrot.slane %v1120_v34, 5 }
 0x492   :  { %v1107_v28 = vadd.f32 %v1103_v27, %v5569_v31 }
 0x493   :  { %v3964_v26 = vmul.f32 -1.442695, %v1106_v25 }
 0x494   :  { %v3965_v33 = vmul.f32 -1.442695, %v1107_v28 }
 0x495   :  { %5186 = vpow2.f32 %v3964_v26 }
 0x49f   :  { %v5187_v29 = vpop.eup %5186 }
 0x4a0   :  { %v1114_v30 = vadd.f32 1.0, %v5187_v29 }
 0x4a2   :  { %5188 = vrcp.f32 %v1114_v30 }
 0x4a3   :  { %5190 = vpow2.f32 %v3965_v33 }
 0x4ac   :  { %v5189_v39 = vpop.eup %5188 }
 0x4ad   :  { %v1124_v41 = vmul.f32 %v5189_v39, %v1122_v36  ;;  %v5191_v43 = vpop.eup %5190 }
 0x4ae   :  { %v1115_v47 = vadd.f32 1.0, %v5191_v43 }
 0x4af   :  { %v1125_v42 = vadd.f32 %v1124_v41, %v5578_v44 }
 0x4b1   :  { %5192 = vtanh.f32 %v1125_v42 }
 0x4b2   :  { %5194 = vrcp.f32 %v1115_v47 }
 0x4bb   :  { %v5193_v48 = vpop.eup %5192 }
 0x4bc   :  { %v1128_v50 = vrot.slane %v5193_v48, 1  ;;  %v5195_v53 = vpop.eup %5194 }
 0x4be   :  { %v1130_v51 = vsub.f32 %v5641_v13, %v1128_v50 }
 0x4c0   :  { %v1132_v52 = vrot.slane %v1130_v51, 7 }
 0x4c2   :  { %v1134_v56 = vmul.f32 %v5195_v53, %v1132_v52 }
 0x4c4   :  { %v5670_v59 = vadd.f32 %v5193_v48, %v1134_v56 }
 0x4c6   :  { %v1137_v60 = vrot.slane %v5670_v59, 3 }
 0x4c8   :  { %3966 = vmatmul.mubr.msk.f32.vlgmr.msra.gmra.mrb[10].mxu0 %vm428_vm10, %v1137_v60  ;;  %4314 = vmatmul.mubr.msk.f32.vlgmr.msra.gmra.mrb[12].mxu1 %vm428_vm10, %v1137_v60 }
 0x4c9   :  { %4758 = vmatpush1.bf16.msra.mxu0 %v5487_v45  ;;  %4773 = vmatpush3.bf16.msra.mxu1 %v5481_v40 }
 0x4ca   :  { %4760 = vmatprep.subr.bf16.mxu0 %v5490_v46  ;;  %4774 = vmatprep.subr.bf16.mxu1 %v5397_v1 }
 0x4cb   :  { %1385 = vmatprep.mubr.f32.mxu0 %v5396_v0  ;;  %4332 = vmatprep.mubr.msk.f32.mxu1 %vm5398_vm0, %v5396_v0 }
 0x4cd   :  { %4762 = vmatpush1.bf16.msra.mxu0 %v5500_v54  ;;  %4776 = vmatpush3.bf16.msra.mxu1 %v5492_v49 }
 0x4ce   :  { %4764 = vmatprep.subr.bf16.mxu0 %v5505_v55  ;;  %4777 = vmatprep.subr.bf16.mxu1 %v5397_v1 }
 0x4d1   :  { %4766 = vmatpush1.bf16.msra.mxu0 %v5511_v63  ;;  %4779 = vmatpush3.bf16.msra.mxu1 %v5507_v58 }
 0x4d2   :  { %4768 = vmatprep.subr.bf16.mxu0 %v5515_v2  ;;  %4780 = vmatprep.subr.bf16.mxu1 %v5397_v1 }
 0x4d5   :  { %4770 = vmatpush1.bf16.msra.mxu0 %v5521_v6  ;;  %4782 = vmatpush3.bf16.msra.mxu1 %v5517_v5 }
 0x4d6   :  { %4784 = vmatprep.subr.bf16.mxu0 %v5474_v35  ;;  %4799 = vmatprep.subr.bf16.mxu1 %v5397_v1 }
 0x59b   :  { %v1206_v61 = vpop.f32.mrb[10].mxu0  ;;  %v1277_v62 = vpop.f32.mrb[12].mxu1 }
 0x59c   :  { %v1283_v3 = vrot.slane %v1206_v61, 4  ;;  %v1208_v4 = vpop.f32.mrb[11].mxu0  ;;  %v4315_v7 = vpop.f32.mrb[13].mxu1  ;;  %v1301_v16 = vadd.f32 %v1277_v62, %v5573_v38 }
 0x59d   :  { %v1284_v10 = vrot.slane %v1208_v4, 4 }
 0x59e   :  { %v1287_v8 = vadd.f32 %v1283_v3, %v5563_v22  ;;  %v1303_v20 = vrot.slane %v1301_v16, 4 }
 0x59f   :  { %v1288_v11 = vadd.f32 %v1284_v10, %v5569_v31 }
 0x5a0   :  { %v3968_v9 = vmul.f32 -1.442695, %v1287_v8 }
 0x5a1   :  { %v3969_v15 = vmul.f32 -1.442695, %v1288_v11 }
 0x5a2   :  { %5196 = vpow2.f32 %v3968_v9 }
 0x5ac   :  { %v5197_v12 = vpop.eup %5196 }
 0x5ad   :  { %v1295_v14 = vadd.f32 1.0, %v5197_v12 }
 0x5af   :  { %5198 = vrcp.f32 %v1295_v14 }
 0x5b0   :  { %5200 = vpow2.f32 %v3969_v15 }
 0x5b9   :  { %v5199_v21 = vpop.eup %5198 }
 0x5ba   :  { %v1305_v24 = vmul.f32 %v5199_v21, %v1303_v20  ;;  %v5201_v26 = vpop.eup %5200 }
 0x5bb   :  { %v1296_v27 = vadd.f32 1.0, %v5201_v26 }
 0x5bc   :  { %v1306_v25 = vadd.f32 %v1305_v24, %v5578_v44 }
 0x5be   :  { %5202 = vtanh.f32 %v1306_v25 }
 0x5bf   :  { %5204 = vrcp.f32 %v1296_v27 }
 0x5c8   :  { %v5203_v28 = vpop.eup %5202 }
 0x5c9   :  { %v1309_v29 = vrot.slane %v5203_v28, 1  ;;  %v5205_v34 = vpop.eup %5204 }
 0x5cb   :  { %v1311_v30 = vsub.f32 %v5670_v59, %v1309_v29 }
 0x5cd   :  { %v1313_v33 = vrot.slane %v1311_v30, 7 }
 0x5cf   :  { %v1315_v36 = vmul.f32 %v5205_v34, %v1313_v33 }
 0x5d1   :  { %v5699_v39 = vadd.f32 %v5203_v28, %v1315_v36 }
 0x5d3   :  { %v1318_v41 = vrot.slane %v5699_v39, 4 }
 0x5d5   :  { %3970 = vmatmul.mubr.msk.f32.vlgmr.msra.gmra.mrb[12].mxu0 %vm428_vm10, %v1318_v41  ;;  %4333 = vmatmul.mubr.msk.f32.vlgmr.msra.gmra.mrb[14].mxu1 %vm428_vm10, %v1318_v41 }
 0x5d6   :  { %4786 = vmatpush1.bf16.msra.mxu0 %v5487_v45  ;;  %4801 = vmatpush3.bf16.msra.mxu1 %v5481_v40 }
 0x5d7   :  { %4788 = vmatprep.subr.bf16.mxu0 %v5490_v46  ;;  %4802 = vmatprep.subr.bf16.mxu1 %v5397_v1 }
 0x5d8   :  { %1566 = vmatprep.mubr.f32.mxu0 %v5396_v0  ;;  %4351 = vmatprep.mubr.msk.f32.mxu1 %vm5398_vm0, %v5396_v0 }
 0x5da   :  { %4790 = vmatpush1.bf16.msra.mxu0 %v5500_v54  ;;  %4804 = vmatpush3.bf16.msra.mxu1 %v5492_v49 }
 0x5db   :  { %4792 = vmatprep.subr.bf16.mxu0 %v5505_v55  ;;  %4805 = vmatprep.subr.bf16.mxu1 %v5397_v1 }
 0x5de   :  { %4794 = vmatpush1.bf16.msra.mxu0 %v5511_v63  ;;  %4807 = vmatpush3.bf16.msra.mxu1 %v5507_v58 }
 0x5df   :  { %4796 = vmatprep.subr.bf16.mxu0 %v5515_v2  ;;  %4808 = vmatprep.subr.bf16.mxu1 %v5397_v1 }
 0x5e2   :  { %4798 = vmatpush1.bf16.msra.mxu0 %v5521_v6  ;;  %4810 = vmatpush3.bf16.msra.mxu1 %v5517_v5 }
 0x5e3   :  { %4812 = vmatprep.subr.bf16.mxu0 %v5474_v35  ;;  %4827 = vmatprep.subr.bf16.mxu1 %v5397_v1 }
 0x6a8   :  { %v1387_v42 = vpop.f32.mrb[12].mxu0  ;;  %v1458_v43 = vpop.f32.mrb[14].mxu1 }
 0x6a9   :  { %v1464_v47 = vrot.slane %v1387_v42, 3  ;;  %v1389_v48 = vpop.f32.mrb[13].mxu0  ;;  %v4334_v50 = vpop.f32.mrb[15].mxu1  ;;  %v1482_v35 = vadd.f32 %v1458_v43, %v5573_v38 }
 0x6aa   :  { %v1465_v53 = vrot.slane %v1389_v48, 3 }
 0x6ab   :  { %v1468_v51 = vadd.f32 %v1464_v47, %v5563_v22  ;;  %v1484_v3 = vrot.slane %v1482_v35, 3  ;;  %v1949_v35 = vld [vmem:[#allocation5 + $0x220] sm:$0xff] }
 0x6ac   :  { %v1469_v56 = vadd.f32 %v1465_v53, %v5569_v31  ;;  %v1948_v53 = vld [vmem:[#allocation5 + $0x218] sm:$0xff] }
 0x6ad   :  { %v3972_v52 = vmul.f32 -1.442695, %v1468_v51 }
 0x6ae   :  { %v3973_v62 = vmul.f32 -1.442695, %v1469_v56  ;;  %v1951_v56 = vld [vmem:[#allocation5 + $0x230] sm:$0xff] }
 0x6af   :  { %5206 = vpow2.f32 %v3972_v52 }
 0x6b9   :  { %v5207_v60 = vpop.eup %5206 }
 0x6ba   :  { %v1476_v61 = vadd.f32 1.0, %v5207_v60  ;;  %v4839_v60 = vpack.c.bf16 %v1951_v56, %v1948_v53 }
 0x6bc   :  { %5208 = vrcp.f32 %v1476_v61  ;;  %v1947_v61 = vld [vmem:[#allocation5 + $0x210] sm:$0xff] }
 0x6bd   :  { %5210 = vpow2.f32 %v3973_v62  ;;  %v1950_v62 = vld [vmem:[#allocation5 + $0x228] sm:$0xff] }
 0x6c6   :  { %v5209_v4 = vpop.eup %5208 }
 0x6c7   :  { %v1486_v7 = vmul.f32 %v5209_v4, %v1484_v3  ;;  %v5211_v9 = vpop.eup %5210  ;;  %v4841_v3 = vpack.c.bf16 %v1950_v62, %v1947_v61  ;;  %v1952_v4 = vld [vmem:[#allocation5 + $0x238] sm:$0xff] }
 0x6c8   :  { %v1477_v10 = vadd.f32 1.0, %v5211_v9  ;;  %v1957_v9 = vld [vmem:[#allocation5 + $0x260] sm:$0xff] }
 0x6c9   :  { %v1487_v8 = vadd.f32 %v1486_v7, %v5578_v44  ;;  %v4856_v7 = vpack.c.bf16 %v1952_v4, %v1949_v35 }
 0x6cb   :  { %5212 = vtanh.f32 %v1487_v8  ;;  %v1954_v8 = vld [vmem:[#allocation5 + $0x248] sm:$0xff] }
 0x6cc   :  { %5214 = vrcp.f32 %v1477_v10  ;;  %v4843_v10 = vpack.c.bf16 %v1957_v9, %v1954_v8 }
 0x6d5   :  { %v5213_v11 = vpop.eup %5212 }
 0x6d6   :  { %v1490_v12 = vrot.slane %v5213_v11, 1  ;;  %v5215_v16 = vpop.eup %5214 }
 0x6d8   :  { %v1492_v14 = vsub.f32 %v5699_v39, %v1490_v12  ;;  %v1956_v12 = vld [vmem:[#allocation5 + $0x258] sm:$0xff] }
 0x6da   :  { %v1494_v15 = vrot.slane %v1492_v14, 7  ;;  %v1955_v14 = vld [vmem:[#allocation5 + $0x250] sm:$0xff] }
 0x6dc   :  { %v1496_v20 = vmul.f32 %v5215_v16, %v1494_v15  ;;  %v1958_v16 = vld [vmem:[#allocation5 + $0x268] sm:$0xff] }
 0x6de   :  { %v5728_v21 = vadd.f32 %v5213_v11, %v1496_v20  ;;  %v1953_v11 = vld [vmem:[#allocation5 + $0x240] sm:$0xff]  ;;  %v1960_v20 = vld [vmem:[#allocation5 + $0x278] sm:$0xff] }
 0x6df   :  { %v4845_v15 = vpack.c.bf16 %v1956_v12, %v1953_v11  ;;  %v5778_v12 = vand.u32 127, %v46_v17 }
 0x6e0   :  { %v1499_v24 = vrot.slane %v5728_v21, 5 }
 0x6e1   :  { %vm48_vm11 = vcmp.lt.s32.totalorder %v5778_v12, 32 }
 0x6e2   :  { %3974 = vmatmul.mubr.msk.f32.vlgmr.msra.gmra.mrb[14].mxu0 %vm428_vm10, %v1499_v24  ;;  %4352 = vmatmul.mubr.msk.f32.vlgmr.msra.gmra.mrb[16].mxu1 %vm428_vm10, %v1499_v24  ;;  %v1963_v24 = vld [vmem:[#allocation5 + $0x290] sm:$0xff] }
 0x6e3   :  { %4814 = vmatpush1.bf16.msra.mxu0 %v5487_v45  ;;  %4829 = vmatpush3.bf16.msra.mxu1 %v5481_v40  ;;  %v3986_v40 = vld [vmem:[%s6140_s1 + $0x3] ss:$0 sm:$0xff] }
 0x6e4   :  { %4816 = vmatprep.subr.bf16.mxu0 %v5490_v46  ;;  %4830 = vmatprep.subr.bf16.mxu1 %v5397_v1 }
 0x6e5   :  { %1747 = vmatprep.mubr.f32.mxu0 %v5396_v0  ;;  %4370 = vmatprep.mubr.msk.f32.mxu1 %vm5398_vm0, %v5396_v0 }
 0x6e6   :  { %2310 = vrot.lane.b32.xlu0 %v3986_v40, %s5399_s2  ;;  %v4859_v40 = vpack.c.bf16 %v1958_v16, %v1955_v14 }
 0x6e7   :  { %4818 = vmatpush1.bf16.msra.mxu0 %v5500_v54  ;;  %4832 = vmatpush3.bf16.msra.mxu1 %v5492_v49 }
 0x6e8   :  { %4820 = vmatprep.subr.bf16.mxu0 %v5505_v55  ;;  %4833 = vmatprep.subr.bf16.mxu1 %v5397_v1 }
 0x6eb   :  { %4822 = vmatpush1.bf16.msra.mxu0 %v5511_v63  ;;  %4835 = vmatpush3.bf16.msra.mxu1 %v5507_v58 }
 0x6ec   :  { %4824 = vmatprep.subr.bf16.mxu0 %v5515_v2  ;;  %4836 = vmatprep.subr.bf16.mxu1 %v5397_v1 }
 0x6ef   :  { %4826 = vmatpush1.bf16.msra.mxu0 %v5521_v6  ;;  %4838 = vmatpush3.bf16.msra.mxu1 %v5517_v5 }
 0x6f0   :  { %4855 = vmatprep.subr.bf16.mxu1 %v5397_v1  ;;  %4840 = vmatprep.subr.bf16.mxu0 %v4839_v60 }
 0x7b5   :  { %v1568_v45 = vpop.f32.mrb[14].mxu0  ;;  %v1639_v46 = vpop.f32.mrb[16].mxu1 }
 0x7b6   :  { %v1645_v49 = vrot.slane %v1568_v45, 2  ;;  %v1570_v54 = vpop.f32.mrb[15].mxu0  ;;  %v4353_v55 = vpop.f32.mrb[17].mxu1  ;;  %v1663_v27 = vadd.f32 %v1639_v46, %v5573_v38  ;;  %v4847_v45 = vpack.c.bf16 %v1963_v24, %v1960_v20  ;;  %v1959_v46 = vld [vmem:[#allocation5 + $0x270] sm:$0xff]  ;;  %v1870_v20 = vrot.slane %v5699_v39, 1 }
 0x7b7   :  { %v1646_v2 = vrot.slane %v1570_v54, 2  ;;  %v1961_v54 = vld [vmem:[#allocation5 + $0x280] sm:$0xff]  ;;  %v1876_v24 = vrot.slane %v5641_v13, 5 }
 0x7b8   :  { %v1649_v58 = vadd.f32 %v1645_v49, %v5563_v22  ;;  %v1665_v28 = vrot.slane %v1663_v27, 2  ;;  %v1962_v49 = vld [vmem:[#allocation5 + $0x288] sm:$0xff]  ;;  %v1967_v27 = vld [vmem:[#allocation5 + $0x2b0] sm:$0xff] }
 0x7b9   :  { %v1650_v5 = vadd.f32 %v1646_v2, %v5569_v31  ;;  %v4849_v55 = vpack.c.bf16 %v1962_v49, %v1959_v46  ;;  %v1969_v2 = vld [vmem:[#allocation5 + $0x2c0] sm:$0xff]  ;;  %v1873_v46 = vrot.slane %v5670_v59, 7 }
 0x7ba   :  { %v3976_v63 = vmul.f32 -1.442695, %v1649_v58  ;;  %v1964_v58 = vld [vmem:[#allocation5 + $0x298] sm:$0xff] }
 0x7bb   :  { %v3977_v26 = vmul.f32 -1.442695, %v1650_v5  ;;  %v4862_v5 = vpack.c.bf16 %v1964_v58, %v1961_v54  ;;  %v5796_v54 = vsel %vm48_vm11, %v5728_v21, %v1876_v24  ;;  %v5801_v58 = vsel %vm48_vm11, %v5699_v39, %v1873_v46  ;;  %v1944_v46 = vld [vmem:[#allocation5 + $0x1f8] sm:$0xff] }
 0x7bc   :  { %5216 = vpow2.f32 %v3976_v63  ;;  %v1966_v63 = vld [vmem:[#allocation5 + $0x2a8] sm:$0xff] }
 0x7c6   :  { %v5217_v6 = vpop.eup %5216 }
 0x7c7   :  { %v1657_v25 = vadd.f32 1.0, %v5217_v6  ;;  %v4851_v6 = vpack.c.bf16 %v1969_v2, %v1966_v63  ;;  %v1872_v2 = vsel %vm48_vm11, %v5670_v59, %v1870_v20  ;;  %v1926_v59 = vld [vmem:[#allocation5 + $0x168] sm:$0xff] }
 0x7c9   :  { %5218 = vrcp.f32 %v1657_v25  ;;  %v1965_v25 = vld [vmem:[#allocation5 + $0x2a0] sm:$0xff] }
 0x7ca   :  { %5220 = vpow2.f32 %v3977_v26  ;;  %v1968_v26 = vld [vmem:[#allocation5 + $0x2b8] sm:$0xff] }
 0x7d3   :  { %v5219_v29 = vpop.eup %5218 }
 0x7d4   :  { %v1667_v30 = vmul.f32 %v5219_v29, %v1665_v28  ;;  %v5221_v34 = vpop.eup %5220  ;;  %v1970_v28 = vld [vmem:[#allocation5 + $0x2c8] sm:$0xff]  ;;  %v1924_v29 = vld [vmem:[#allocation5 + $0x158] sm:$0xff] }
 0x7d5   :  { %v1658_v36 = vadd.f32 1.0, %v5221_v34  ;;  %v4865_v34 = vpack.c.bf16 %v1970_v28, %v1967_v27  ;;  %v1923_v27 = vld [vmem:[#allocation5 + $0x150] sm:$0xff] }
 0x7d6   :  { %v1668_v33 = vadd.f32 %v1667_v30, %v5578_v44  ;;  %v1927_v30 = vld [vmem:[#allocation5 + $0x170] sm:$0xff] }
 0x7d8   :  { %5222 = vtanh.f32 %v1668_v33  ;;  %v4853_v33 = vpack.c.bf16 %v1968_v26, %v1965_v25  ;;  %v1902_v25 = vrot.slane %v5801_v58, 1 }
 0x7d9   :  { %5224 = vrcp.f32 %v1658_v36  ;;  %v4867_v36 = vpack.c.bf16 %v1927_v30, %v1924_v29  ;;  %v1905_v29 = vrot.slane %v1872_v2, 7 }
 0x7e2   :  { %v5223_v41 = vpop.eup %5222 }
 0x7e3   :  { %v1671_v42 = vrot.slane %v5223_v41, 1  ;;  %v5225_v48 = vpop.eup %5224 }
 0x7e5   :  { %v1673_v43 = vsub.f32 %v5728_v21, %v1671_v42 }
 0x7e7   :  { %v1675_v47 = vrot.slane %v1673_v43, 7 }
 0x7e9   :  { %v1677_v50 = vmul.f32 %v5225_v48, %v1675_v47 }
 0x7eb   :  { %v5760_v51 = vadd.f32 %v5223_v41, %v1677_v50 }
 0x7ed   :  { %v1680_v52 = vrot.slane %v5760_v51, 6  ;;  %v1864_v49 = vrot.slane %v5760_v51, 5 }
 0x7ef   :  { %3978 = vmatmul.mubr.msk.f32.vlgmr.msra.gmra.mrb[16].mxu0 %vm428_vm10, %v1680_v52  ;;  %4371 = vmatmul.mubr.msk.f32.vlgmr.msra.gmra.mrb[18].mxu1 %vm428_vm10, %v1680_v52  ;;  %v1866_v39 = vsel %vm48_vm11, %v5612_v32, %v1864_v49  ;;  %v1943_v49 = vld [vmem:[#allocation5 + $0x1f0] sm:$0xff] }
 0x7f0   :  { %2065 = vmatprep.mubr.f32.mxu0 %v5396_v0  ;;  %4389 = vmatprep.mubr.msk.f32.mxu1 %vm5398_vm0, %v5396_v0 }
 0x7f1   :  { %4842 = vmatpush1.bf16.msra.mxu0 %v4841_v3  ;;  %4857 = vmatpush3.bf16.msra.mxu1 %v4856_v7 }
 0x7f2   :  { %4858 = vmatprep.subr.bf16.mxu1 %v5397_v1  ;;  %4844 = vmatprep.subr.bf16.mxu0 %v4843_v10 }
 0x7f5   :  { %4846 = vmatpush1.bf16.msra.mxu0 %v4845_v15  ;;  %4860 = vmatpush3.bf16.msra.mxu1 %v4859_v40 }
 0x7f6   :  { %4848 = vmatprep.subr.bf16.mxu0 %v4847_v45  ;;  %4861 = vmatprep.subr.bf16.mxu1 %v5397_v1  ;;  %v1867_v45 = vrot.slane %v5728_v21, 3 }
 0x7f8   :  { %v1869_v21 = vsel %vm48_vm11, %v5641_v13, %v1867_v45  ;;  %v1925_v13 = vld [vmem:[#allocation5 + $0x160] sm:$0xff] }
 0x7f9   :  { %4850 = vmatpush1.bf16.msra.mxu0 %v4849_v55  ;;  %4863 = vmatpush3.bf16.msra.mxu1 %v4862_v5 }
 0x7fa   :  { %4852 = vmatprep.subr.bf16.mxu0 %v4851_v6  ;;  %4864 = vmatprep.subr.bf16.mxu1 %v5397_v1  ;;  %v1899_v6 = vrot.slane %v5796_v54, 3 }
 0x7fd   :  { %4854 = vmatpush1.bf16.msra.mxu0 %v4853_v33  ;;  %4866 = vmatpush3.bf16.msra.mxu1 %v4865_v34  ;;  %v1928_v33 = vld [vmem:[#allocation5 + $0x178] sm:$0xff]  ;;  %v1908_v34 = vrot.slane %v1869_v21, 5 }
 0x7fe   :  { %4868 = vmatprep.subr.bf16.mxu0 %v4867_v36  ;;  %4883 = vmatprep.subr.bf16.mxu1 %v5397_v1 }
 0x8c2   :  { %v1749_v41 = vpop.f32.mrb[16].mxu0  ;;  %v1820_v42 = vpop.f32.mrb[18].mxu1 }
 0x8c3   :  { %v1826_v43 = vrot.slane %v1749_v41, 1  ;;  %v1751_v47 = vpop.f32.mrb[17].mxu0  ;;  %v4372_v48 = vpop.f32.mrb[19].mxu1  ;;  %v1844_v35 = vadd.f32 %v1820_v42, %v5573_v38  ;;  %v1879_v38 = vrot.slane %v5612_v32, 3  ;;  %v1930_v41 = vld [vmem:[#allocation5 + $0x188] sm:$0xff]  ;;  %v1933_v32 = vld [vmem:[#allocation5 + $0x1a0] sm:$0xff] }
 0x8c4   :  { %v1827_v53 = vrot.slane %v1751_v47, 1  ;;  %v1911_v42 = vrot.slane %v1866_v39, 3  ;;  %v4869_v47 = vpack.c.bf16 %v1926_v59, %v1923_v27  ;;  %v1974_v27 = vld [vmem:[#allocation5 + $0x2e8] sm:$0xff]  ;;  %v1973_v59 = vld [vmem:[#allocation5 + $0x2e0] sm:$0xff] }
 0x8c5   :  { %v1830_v50 = vadd.f32 %v1826_v43, %v5563_v22  ;;  %v1846_v3 = vrot.slane %v1844_v35, 1  ;;  %v5790_v17 = vsel %vm48_vm11, %v5760_v51, %v1879_v38  ;;  %v1934_v35 = vld [vmem:[#allocation5 + $0x1a8] sm:$0xff] }
 0x8c6   :  { %v1831_v56 = vadd.f32 %v1827_v53, %v5569_v31  ;;  %v1896_v5 = vrot.slane %v5790_v17, 5  ;;  %v1929_v53 = vld [vmem:[#allocation5 + $0x180] sm:$0xff]  ;;  %v1942_v38 = vld [vmem:[#allocation5 + $0x1e8] sm:$0xff] }
 0x8c7   :  { %v3980_v52 = vmul.f32 -1.442695, %v1830_v50 }
 0x8c8   :  { %v3981_v62 = vmul.f32 -1.442695, %v1831_v56 }
 0x8c9   :  { %5226 = vpow2.f32 %v3980_v52 }
 0x8d3   :  { %v5227_v60 = vpop.eup %5226 }
 0x8d4   :  { %v1838_v61 = vadd.f32 1.0, %v5227_v60  ;;  %v4871_v60 = vpack.c.bf16 %v1933_v32, %v1930_v41  ;;  %v1979_v41 = vld [vmem:[#allocation5 + $0x310] sm:$0xff]  ;;  %v1982_v32 = vld [vmem:[#allocation5 + $0x328] sm:$0xff] }
 0x8d6   :  { %5228 = vrcp.f32 %v1838_v61  ;;  %v1932_v61 = vld [vmem:[#allocation5 + $0x198] sm:$0xff] }
 0x8d7   :  { %5230 = vpow2.f32 %v3981_v62  ;;  %v1931_v62 = vld [vmem:[#allocation5 + $0x190] sm:$0xff] }
 0x8e0   :  { %v5229_v4 = vpop.eup %5228 }
 0x8e1   :  { %v1848_v7 = vmul.f32 %v5229_v4, %v1846_v3  ;;  %v5231_v9 = vpop.eup %5230  ;;  %v1936_v4 = vld [vmem:[#allocation5 + $0x1b8] sm:$0xff] }
 0x8e2   :  { %v1839_v22 = vadd.f32 1.0, %v5231_v9  ;;  %v4873_v9 = vpack.c.bf16 %v1932_v61, %v1929_v53  ;;  %v1988_v53 = vld [vmem:[#allocation5 + $0x358] sm:$0xff] }
 0x8e3   :  { %v1849_v8 = vadd.f32 %v1848_v7, %v5578_v44  ;;  %v1882_v44 = vrot.slane %v5582_v57, 1  ;;  %v1939_v7 = vld [vmem:[#allocation5 + $0x1d0] sm:$0xff] }
 0x8e5   :  { %5232 = vtanh.f32 %v1849_v8 }
 0x8e6   :  { %5234 = vrcp.f32 %v1839_v22  ;;  %v4887_v22 = vpack.c.bf16 %v1934_v35, %v1931_v62  ;;  %v1989_v35 = vld [vmem:[#allocation5 + $0x360] sm:$0xff] }
 0x8ef   :  { %v5233_v10 = vpop.eup %5232 }
 0x8f0   :  { %v1852_v11 = vrot.slane %v5233_v10, 1  ;;  %v5235_v15 = vpop.eup %5234 }
 0x8f2   :  { %v1854_v31 = vsub.f32 %v5760_v51, %v1852_v11  ;;  %v4875_v11 = vpack.c.bf16 %v1939_v7, %v1936_v4  ;;  %v1992_v4 = vld [vmem:[#allocation5 + $0x378] sm:$0xff]  ;;  %v1991_v7 = vld [vmem:[#allocation5 + $0x370] sm:$0xff] }
 0x8f4   :  { %v1856_v14 = vrot.slane %v1854_v31, 7  ;;  %v1938_v31 = vld [vmem:[#allocation5 + $0x1c8] sm:$0xff] }
 0x8f6   :  { %v1858_v16 = vmul.f32 %v5235_v15, %v1856_v14  ;;  %v1937_v14 = vld [vmem:[#allocation5 + $0x1c0] sm:$0xff]  ;;  %v1940_v15 = vld [vmem:[#allocation5 + $0x1d8] sm:$0xff] }
 0x8f7   :  { %v4890_v24 = vpack.c.bf16 %v1940_v15, %v1937_v14 }
 0x8f8   :  { %v1859_v40 = vadd.f32 %v5233_v10, %v1858_v16  ;;  %v1935_v10 = vld [vmem:[#allocation5 + $0x1b0] sm:$0xff]  ;;  %v1945_v16 = vld [vmem:[#allocation5 + $0x200] sm:$0xff] }
 0x8f9   :  { %v4877_v20 = vpack.c.bf16 %v1938_v31, %v1935_v10  ;;  %v4879_v45 = vpack.c.bf16 %v1945_v16, %v1942_v38  ;;  %v44_v10 = vld [vmem:[%s6140_s1 + $0x2] sm:$0x1]  ;;  %s5400_s1 = smov [#allocation7]  }
 0x8fa   :  { %v1861_v55 = vrot.slane %v1859_v40, 7  ;;  %v5805_v63 = vsel %vm48_vm11, %v1859_v40, %v1882_v44  ;;  %v1941_v40 = vld [vmem:[#allocation5 + $0x1e0] sm:$0xff]  ;;  %s3935_s18 = sshll.u32 %s5400_s1, 4  ;;  %s3936_s18 = int_to_ptr.vmem [resolvable:$true] %s3935_s18 }
 0x8fb   :  { %v1893_v51 = vrot.slane %v5805_v63, 7  ;;  %s5364_s19 = scalar_lea.vmem %s3936_s18, 16  ;;  %s5368_s20 = scalar_lea.vmem %s3936_s18, 32 }
 0x8fc   :  { %v1863_v28 = vsel %vm48_vm11, %v5582_v57, %v1861_v55  ;;  %v4884_v57 = vpack.c.bf16 %v1928_v33, %v1925_v13  ;;  %v1946_v55 = vld [vmem:[#allocation5 + $0x208] sm:$0xff]  ;;  %p5365_p2 = scmp.ne.s32.totalorder %s3936_s18, %s5364_s19  ;;  %p5369_p3 = scmp.lt.s32.totalorder %s3936_s18, %s3936_s18 }
 0x8fd   :  { %v1916_v26 = vsel %vm58_vm1, %v1893_v51, %v1896_v5  ;;  %v1885_v48 = vsel %vm58_vm1, %v1863_v28, %v1866_v39  ;;  %v1914_v50 = vrot.slane %v1863_v28, 1  ;;  %v1972_v5 = vld [vmem:[#allocation5 + $0x2d8] sm:$0xff]  ;;  %p5370_p4 = scmp.lt.s32.totalorder %s5368_s20, %s5364_s19 }
 0x8fe   :  { %v1917_v30 = vsel %vm60_vm2, %v1916_v26, %v1899_v6  ;;  %v1886_v8 = vsel %vm60_vm2, %v1885_v48, %v1869_v21  ;;  %v1975_v21 = vld [vmem:[#allocation5 + $0x2f0] sm:$0xff]  ;;  %v4893_v6 = vpack.c.bf16 %v1946_v55, %v1943_v49  ;;  %v1976_v28 = vld [vmem:[#allocation5 + $0x2f8] sm:$0xff]  ;;  %v5865_v48 = vpack.c.bf16 %v1982_v32, %v1979_v41 }
 0x8ff   :  { %v1918_v36 = vsel %vm62_vm3, %v1917_v30, %v1902_v25  ;;  %v1887_v44 = vsel %vm62_vm3, %v1886_v8, %v1872_v2  ;;  %v4881_v2 = vpack.c.bf16 %v1944_v46, %v1941_v40  ;;  %v1971_v25 = vld [vmem:[#allocation5 + $0x2d0] sm:$0xff]  ;;  %v5845_v26 = vpack.c.bf16 %v1975_v21, %v1972_v5  ;;  %v1994_v8 = vld [vmem:[#allocation5 + $0x388] sm:$0xff]  ;;  %p5371_p5 = por %p5370_p4, %p5369_p3 }
 0x900   :  { %v1919_v43 = vsel %vm64_vm4, %v1918_v36, %v1905_v29  ;;  %v1888_v51 = vsel %vm64_vm4, %v1887_v44, %v5801_v58  ;;  %v1978_v29 = vld [vmem:[#allocation5 + $0x308] sm:$0xff]  ;;  %v1981_v58 = vld [vmem:[#allocation5 + $0x320] sm:$0xff]  ;;  %v5849_v13 = vpack.c.bf16 %v1974_v27, %v1971_v25  ;;  %v5851_v33 = vpack.c.bf16 %v1976_v28, %v1973_v59  ;;  %v1980_v36 = vld [vmem:[#allocation5 + $0x318] sm:$0xff] }
 0x901   :  { %v1920_v52 = vsel %vm66_vm5, %v1919_v43, %v1908_v34  ;;  %v1889_v39 = vsel %vm66_vm5, %v1888_v51, %v5796_v54  ;;  %v1977_v54 = vld [vmem:[#allocation5 + $0x300] sm:$0xff]  ;;  %v5855_v34 = vpack.c.bf16 %v1981_v58, %v1978_v29  ;;  %v1987_v43 = vld [vmem:[#allocation5 + $0x350] sm:$0xff]  ;;  %v5935_v28 = vld [vmem:[#allocation5 + $0x3a8] ss:$0 sm:$0xff]  ;;  %p5372_p6 = pnand %p5371_p5, %p5365_p2 }
 0x902   :  { %v1921_v56 = vsel %vm68_vm6, %v1920_v52, %v1911_v42  ;;  %v1890_v30 = vsel %vm68_vm6, %v1889_v39, %v5790_v17  ;;  %v1984_v17 = vld [vmem:[#allocation5 + $0x338] sm:$0xff]  ;;  %v1986_v52 = vld [vmem:[#allocation5 + $0x348] sm:$0xff] }
 0x903   :  { %v1922_v3 = vsel %vm70_vm7, %v1921_v56, %v1914_v50  ;;  %v1891_v42 = vsel %vm70_vm7, %v1890_v30, %v5805_v63  ;;  %v1983_v50 = vld [vmem:[#allocation5 + $0x330] sm:$0xff]  ;;  %v5869_v63 = vpack.c.bf16 %v1987_v43, %v1984_v17  ;;  %v1990_v56 = vld [vmem:[#allocation5 + $0x368] sm:$0xff] }
 0x904   :  { %3982 = vmatmul.mubr.msk.f32.vlgmr.msra.gmra.mrb[18].mxu0 %vm428_vm10, %v1922_v3  ;;  %4390 = vmatmul.mubr.msk.f32.vlgmr.msra.gmra.mrb[20].mxu1 %vm428_vm10, %v1922_v3  ;;  %v5876_v61 = vpack.c.bf16 %v1986_v52, %v1983_v50  ;;  %v1996_v40 = vld [vmem:[#allocation5 + $0x390] ss:$8 sm:$0x7] }
 0x905   :  { %4870 = vmatpush1.bf16.msra.mxu0 %v4869_v47  ;;  %4885 = vmatpush3.bf16.msra.mxu1 %v4884_v57  ;;  %v5863_v47 = vpack.c.bf16 %v1980_v36, %v1977_v54  ;;  %v1985_v57 = vld [vmem:[#allocation5 + $0x340] sm:$0xff]  ;;  %v2298_v29 = vrot.slane %v1996_v40, %v410_v37 }
 0x906   :  { %4872 = vmatprep.subr.bf16.mxu0 %v4871_v60  ;;  %4886 = vmatprep.subr.bf16.mxu1 %v5397_v1  ;;  %v1993_v60 = vld [vmem:[#allocation5 + $0x380] sm:$0xff]  ;;  %v5878_v62 = vpack.c.bf16 %v1988_v53, %v1985_v57 }
 0x907   :  { %2209 = vmatprep.mubr.f32.mxu0 %v5396_v0  ;;  %4408 = vmatprep.mubr.msk.f32.mxu1 %vm5398_vm0, %v5396_v0  ;;  %v5882_v3 = vpack.c.bf16 %v1993_v60, %v1990_v56 }
 0x909   :  { %4874 = vmatpush1.bf16.msra.mxu0 %v4873_v9  ;;  %4888 = vmatpush3.bf16.msra.mxu1 %v4887_v22  ;;  %v5886_v9 = vpack.c.bf16 %v1992_v4, %v1989_v35  ;;  %v5888_v22 = vpack.c.bf16 %v1994_v8, %v1991_v7 }
 0x90a   :  { %4876 = vmatprep.subr.bf16.mxu0 %v4875_v11  ;;  %4889 = vmatprep.subr.bf16.mxu1 %v5397_v1  ;;  %v2311_v11 = vpop.permute.xlu0 %2310 }
 0x90b   :  { %v5898_v31 = vsel %vm426_vm9, %v44_v10, %v2311_v11 }
 0x90d   :  { %4878 = vmatpush1.bf16.msra.mxu0 %v4877_v20  ;;  %4891 = vmatpush3.bf16.msra.mxu1 %v4890_v24 }
 0x90e   :  { %4880 = vmatprep.subr.bf16.mxu0 %v4879_v45  ;;  %4892 = vmatprep.subr.bf16.mxu1 %v5397_v1  ;;  %v2290_v45 = vrot.slane %v1996_v40, %v402_v19 }
 0x911   :  { %4882 = vmatpush1.bf16.msra.mxu0 %v4881_v2  ;;  %4894 = vmatpush3.bf16.msra.mxu1 %v4893_v6  ;;  %v2294_v2 = vrot.slane %v1996_v40, %v406_v23 }
 0x912   :  { %4896 = vmatprep.subr.bf16.mxu0 %v5845_v26  ;;  %4911 = vmatprep.subr.bf16.mxu1 %v5397_v1 }
 0x914   :  { %3984 = vmatmul.mubr.msk.f32.vlgmr.msra.gmra.mrb[18].mxu0 %vm428_vm10, %v1891_v42  ;;  %4409 = vmatmul.mubr.msk.f32.vlgmr.msra.gmra.mrb[22].mxu1 %vm428_vm10, %v1891_v42 }
 0x915   :  { %4898 = vmatpush1.bf16.msra.mxu0 %v5849_v13  ;;  %4913 = vmatpush3.bf16.msra.mxu1 %v5851_v33 }
 0x916   :  { %4900 = vmatprep.subr.bf16.mxu0 %v5855_v34  ;;  %4914 = vmatprep.subr.bf16.mxu1 %v5397_v1 }
 0x917   :  { %2381 = vmatprep.mubr.f32.mxu0 %v5396_v0  ;;  %4427 = vmatprep.mubr.msk.f32.mxu1 %vm5398_vm0, %v5396_v0 }
 0x919   :  { %4902 = vmatpush1.bf16.msra.mxu0 %v5863_v47  ;;  %4916 = vmatpush3.bf16.msra.mxu1 %v5865_v48 }
 0x91a   :  { %4904 = vmatprep.subr.bf16.mxu0 %v5869_v63  ;;  %4917 = vmatprep.subr.bf16.mxu1 %v5397_v1 }
 0x91d   :  { %4906 = vmatpush1.bf16.msra.mxu0 %v5876_v61  ;;  %4919 = vmatpush3.bf16.msra.mxu1 %v5878_v62 }
 0x91e   :  { %4908 = vmatprep.subr.bf16.mxu0 %v5882_v3  ;;  %4920 = vmatprep.subr.bf16.mxu1 %v5397_v1 }
 0x921   :  { %4910 = vmatpush1.bf16.msra.mxu0 %v5886_v9  ;;  %4922 = vmatpush3.bf16.msra.mxu1 %v5888_v22 }
 0x922   :  { %4924 = vmatprep.subr.bf16.mxu0 %v5845_v26  ;;  %4939 = vmatprep.subr.bf16.mxu1 %v5397_v1 }
 0x924   :  { %3987 = vmatmul.mubr.msk.f32.vlgmr.msra.gmra.mrb[20].mxu0 %vm428_vm10, %v5898_v31  ;;  %4428 = vmatmul.mubr.msk.f32.vlgmr.msra.gmra.mrb[24].mxu1 %vm428_vm10, %v5898_v31 }
 0x925   :  { %4926 = vmatpush1.bf16.msra.mxu0 %v5849_v13  ;;  %4941 = vmatpush3.bf16.msra.mxu1 %v5851_v33 }
 0x926   :  { %4928 = vmatprep.subr.bf16.mxu0 %v5855_v34  ;;  %4942 = vmatprep.subr.bf16.mxu1 %v5397_v1 }
 0x927   :  { %2546 = vmatprep.mubr.f32.mxu0 %v5396_v0  ;;  %4446 = vmatprep.mubr.msk.f32.mxu1 %vm5398_vm0, %v5396_v0 }
 0x929   :  { %4930 = vmatpush1.bf16.msra.mxu0 %v5863_v47  ;;  %4944 = vmatpush3.bf16.msra.mxu1 %v5865_v48 }
 0x92a   :  { %4932 = vmatprep.subr.bf16.mxu0 %v5869_v63  ;;  %4945 = vmatprep.subr.bf16.mxu1 %v5397_v1 }
 0x92d   :  { %4934 = vmatpush1.bf16.msra.mxu0 %v5876_v61  ;;  %4947 = vmatpush3.bf16.msra.mxu1 %v5878_v62 }
 0x92e   :  { %4936 = vmatprep.subr.bf16.mxu0 %v5882_v3  ;;  %4948 = vmatprep.subr.bf16.mxu1 %v5397_v1 }
 0x931   :  { %4938 = vmatpush1.bf16.msra.mxu0 %v5886_v9  ;;  %4950 = vmatpush3.bf16.msra.mxu1 %v5888_v22 }
 0x932   :  { %4952 = vmatprep.subr.bf16.mxu0 %v5845_v26  ;;  %4967 = vmatprep.subr.bf16.mxu1 %v5397_v1 }
 0x9d7   :  { %v2138_v14 = vpop.f32.mrb[20].mxu1 }
 0x9d8   :  { %v4391_v15 = vpop.f32.mrb[21].mxu1 }
 0x9e7   :  { %v2211_v38 = vpop.f32.mrb[18].mxu0  ;;  %v2282_v16 = vpop.f32.mrb[22].mxu1 }
 0x9e8   :  { %v2283_v44 = vadd.f32 %v2282_v16, %v2138_v14  ;;  %v2213_v20 = vpop.f32.mrb[19].mxu0  ;;  %v4410_v24 = vpop.f32.mrb[23].mxu1  ;;  %v5927_v46 = vadd.f32 %v2290_v45, %v2211_v38 }
 0x9e9   :  { %v5932_v39 = vadd.f32 %v2294_v2, %v2213_v20 }
 0x9ea   :  { %v5940_v54 = vadd.f32 %v2298_v29, %v2283_v44 }
 0x9f7   :  { %v2383_v49 = vpop.f32.mrb[20].mxu0  ;;  %v2454_v55 = vpop.f32.mrb[24].mxu1 }
 0x9f8   :  { %v2458_v51 = vadd.f32 %v2383_v49, %v5927_v46  ;;  %v2385_v5 = vpop.f32.mrb[21].mxu0  ;;  %v4429_v21 = vpop.f32.mrb[25].mxu1  ;;  %v2472_v30 = vadd.f32 %v2454_v55, %v5935_v28 }
 0x9f9   :  { %v2459_v25 = vadd.f32 %v2385_v5, %v5932_v39 }
 0x9fa   :  { %v3989_v6 = vmul.f32 -1.442695, %v2458_v51 }
 0x9fb   :  { %v3990_v27 = vmul.f32 -1.442695, %v2459_v25 }
 0x9fc   :  { %5236 = vpow2.f32 %v3989_v6 }
 0x9fd   :  { %5238 = vpow2.f32 %v3990_v27 }
 0xa06   :  { %v5237_v59 = vpop.eup %5236 }
 0xa07   :  { %v2466_v19 = vadd.f32 1.0, %v5237_v59  ;;  %v5239_v58 = vpop.eup %5238 }
 0xa08   :  { %v2467_v32 = vadd.f32 1.0, %v5239_v58 }
 0xa09   :  { %5240 = vrcp.f32 %v2466_v19 }
 0xa13   :  { %v5241_v23 = vpop.eup %5240 }
 0xa14   :  { %v2473_v36 = vmul.f32 %v5241_v23, %v2472_v30 }
 0xa16   :  { %v2474_v41 = vadd.f32 %v2473_v36, %v5940_v54 }
 0xa18   :  { %5242 = vtanh.f32 %v2474_v41 }
 0xa19   :  { %5244 = vrcp.f32 %v2467_v32 }
 0xa22   :  { %v5243_v42 = vpop.eup %5242 }
 0xa23   :  { %v2476_v17 = vsub.f32 %v5898_v31, %v5243_v42  ;;  %v5245_v43 = vpop.eup %5244 }
 0xa25   :  { %v2477_v50 = vmul.f32 %v5245_v43, %v2476_v17 }
 0xa27   :  { %v5944_v52 = vadd.f32 %v5243_v42, %v2477_v50 }
 0xa29   :  { %3991 = vmatmul.mubr.msk.f32.vlgmr.msra.gmra.mrb[22].mxu0 %vm428_vm10, %v5944_v52  ;;  %4447 = vmatmul.mubr.msk.f32.vlgmr.msra.gmra.mrb[26].mxu1 %vm428_vm10, %v5944_v52 }
 0xa2a   :  { %4954 = vmatpush1.bf16.msra.mxu0 %v5849_v13  ;;  %4969 = vmatpush3.bf16.msra.mxu1 %v5851_v33 }
 0xa2b   :  { %4956 = vmatprep.subr.bf16.mxu0 %v5855_v34  ;;  %4970 = vmatprep.subr.bf16.mxu1 %v5397_v1 }
 0xa2c   :  { %2727 = vmatprep.mubr.f32.mxu0 %v5396_v0  ;;  %4465 = vmatprep.mubr.msk.f32.mxu1 %vm5398_vm0, %v5396_v0 }
 0xa2e   :  { %4958 = vmatpush1.bf16.msra.mxu0 %v5863_v47  ;;  %4972 = vmatpush3.bf16.msra.mxu1 %v5865_v48 }
 0xa2f   :  { %4960 = vmatprep.subr.bf16.mxu0 %v5869_v63  ;;  %4973 = vmatprep.subr.bf16.mxu1 %v5397_v1 }
 0xa32   :  { %4962 = vmatpush1.bf16.msra.mxu0 %v5876_v61  ;;  %4975 = vmatpush3.bf16.msra.mxu1 %v5878_v62 }
 0xa33   :  { %4964 = vmatprep.subr.bf16.mxu0 %v5882_v3  ;;  %4976 = vmatprep.subr.bf16.mxu1 %v5397_v1 }
 0xa36   :  { %4966 = vmatpush1.bf16.msra.mxu0 %v5886_v9  ;;  %4978 = vmatpush3.bf16.msra.mxu1 %v5888_v22 }
 0xa37   :  { %4980 = vmatprep.subr.bf16.mxu0 %v5845_v26  ;;  %4995 = vmatprep.subr.bf16.mxu1 %v5397_v1 }
 0xafc   :  { %v2548_v18 = vpop.f32.mrb[22].mxu0  ;;  %v2619_v37 = vpop.f32.mrb[26].mxu1 }
 0xafd   :  { %v2625_v57 = vrot.slane %v2548_v18, 7  ;;  %v2550_v53 = vpop.f32.mrb[23].mxu0  ;;  %v4448_v56 = vpop.f32.mrb[27].mxu1  ;;  %v2643_v31 = vadd.f32 %v2619_v37, %v5935_v28 }
 0xafe   :  { %v2626_v4 = vrot.slane %v2550_v53, 7 }
 0xaff   :  { %v2629_v60 = vadd.f32 %v2625_v57, %v5927_v46  ;;  %v2645_v14 = vrot.slane %v2643_v31, 7 }
 0xb00   :  { %v2630_v7 = vadd.f32 %v2626_v4, %v5932_v39 }
 0xb01   :  { %v3993_v35 = vmul.f32 -1.442695, %v2629_v60 }
 0xb02   :  { %v3994_v11 = vmul.f32 -1.442695, %v2630_v7 }
 0xb03   :  { %5246 = vpow2.f32 %v3993_v35 }
 0xb0d   :  { %v5247_v8 = vpop.eup %5246 }
 0xb0e   :  { %v2637_v10 = vadd.f32 1.0, %v5247_v8 }
 0xb10   :  { %5248 = vrcp.f32 %v2637_v10 }
 0xb11   :  { %5250 = vpow2.f32 %v3994_v11 }
 0xb1a   :  { %v5249_v15 = vpop.eup %5248 }
 0xb1b   :  { %v2647_v38 = vmul.f32 %v5249_v15, %v2645_v14  ;;  %v5251_v44 = vpop.eup %5250 }
 0xb1c   :  { %v2638_v20 = vadd.f32 1.0, %v5251_v44 }
 0xb1d   :  { %v2648_v16 = vadd.f32 %v2647_v38, %v5940_v54 }
 0xb1f   :  { %5252 = vtanh.f32 %v2648_v16 }
 0xb20   :  { %5254 = vrcp.f32 %v2638_v20 }
 0xb29   :  { %v5253_v24 = vpop.eup %5252 }
 0xb2a   :  { %v2651_v40 = vrot.slane %v5253_v24, 1  ;;  %v5255_v55 = vpop.eup %5254 }
 0xb2c   :  { %v2653_v45 = vsub.f32 %v5944_v52, %v2651_v40 }
 0xb2e   :  { %v2655_v49 = vrot.slane %v2653_v45, 7 }
 0xb30   :  { %v2657_v51 = vmul.f32 %v5255_v55, %v2655_v49 }
 0xb32   :  { %v2658_v5 = vadd.f32 %v5253_v24, %v2657_v51 }
 0xb34   :  { %v2660_v21 = vrot.slane %v2658_v5, 1 }
 0xb36   :  { %3995 = vmatmul.mubr.msk.f32.vlgmr.msra.gmra.mrb[24].mxu0 %vm428_vm10, %v2660_v21  ;;  %4466 = vmatmul.mubr.msk.f32.vlgmr.msra.gmra.mrb[28].mxu1 %vm428_vm10, %v2660_v21 }
 0xb37   :  { %4982 = vmatpush1.bf16.msra.mxu0 %v5849_v13  ;;  %4997 = vmatpush3.bf16.msra.mxu1 %v5851_v33 }
 0xb38   :  { %4984 = vmatprep.subr.bf16.mxu0 %v5855_v34  ;;  %4998 = vmatprep.subr.bf16.mxu1 %v5397_v1 }
 0xb39   :  { %2908 = vmatprep.mubr.f32.mxu0 %v5396_v0  ;;  %4484 = vmatprep.mubr.msk.f32.mxu1 %vm5398_vm0, %v5396_v0 }
 0xb3b   :  { %4986 = vmatpush1.bf16.msra.mxu0 %v5863_v47  ;;  %5000 = vmatpush3.bf16.msra.mxu1 %v5865_v48 }
 0xb3c   :  { %4988 = vmatprep.subr.bf16.mxu0 %v5869_v63  ;;  %5001 = vmatprep.subr.bf16.mxu1 %v5397_v1 }
 0xb3f   :  { %4990 = vmatpush1.bf16.msra.mxu0 %v5876_v61  ;;  %5003 = vmatpush3.bf16.msra.mxu1 %v5878_v62 }
 0xb40   :  { %4992 = vmatprep.subr.bf16.mxu0 %v5882_v3  ;;  %5004 = vmatprep.subr.bf16.mxu1 %v5397_v1 }
 0xb43   :  { %4994 = vmatpush1.bf16.msra.mxu0 %v5886_v9  ;;  %5006 = vmatpush3.bf16.msra.mxu1 %v5888_v22 }
 0xb44   :  { %5008 = vmatprep.subr.bf16.mxu0 %v5845_v26  ;;  %5023 = vmatprep.subr.bf16.mxu1 %v5397_v1 }
 0xc09   :  { %v2729_v2 = vpop.f32.mrb[24].mxu0  ;;  %v2800_v6 = vpop.f32.mrb[28].mxu1 }
 0xc0a   :  { %v2806_v25 = vrot.slane %v2729_v2, 6  ;;  %v2731_v27 = vpop.f32.mrb[25].mxu0  ;;  %v4467_v59 = vpop.f32.mrb[29].mxu1  ;;  %v2824_v32 = vadd.f32 %v2800_v6, %v5935_v28 }
 0xc0b   :  { %v2807_v58 = vrot.slane %v2731_v27, 6 }
 0xc0c   :  { %v2810_v19 = vadd.f32 %v2806_v25, %v5927_v46  ;;  %v2826_v42 = vrot.slane %v2824_v32, 6 }
 0xc0d   :  { %v2811_v30 = vadd.f32 %v2807_v58, %v5932_v39 }
 0xc0e   :  { %v3997_v29 = vmul.f32 -1.442695, %v2810_v19 }
 0xc0f   :  { %v3998_v41 = vmul.f32 -1.442695, %v2811_v30 }
 0xc10   :  { %5256 = vpow2.f32 %v3997_v29 }
 0xc1a   :  { %v5257_v23 = vpop.eup %5256 }
 0xc1b   :  { %v2818_v36 = vadd.f32 1.0, %v5257_v23 }
 0xc1d   :  { %5258 = vrcp.f32 %v2818_v36 }
 0xc1e   :  { %5260 = vpow2.f32 %v3998_v41 }
 0xc27   :  { %v5259_v17 = vpop.eup %5258 }
 0xc28   :  { %v2828_v43 = vmul.f32 %v5259_v17, %v2826_v42  ;;  %v5261_v18 = vpop.eup %5260 }
 0xc29   :  { %v2819_v37 = vadd.f32 1.0, %v5261_v18 }
 0xc2a   :  { %v2829_v50 = vadd.f32 %v2828_v43, %v5940_v54 }
 0xc2c   :  { %5262 = vtanh.f32 %v2829_v50 }
 0xc2d   :  { %5264 = vrcp.f32 %v2819_v37 }
 0xc36   :  { %v5263_v57 = vpop.eup %5262 }
 0xc37   :  { %v2832_v53 = vrot.slane %v5263_v57, 1  ;;  %v5265_v35 = vpop.eup %5264 }
 0xc39   :  { %v2834_v56 = vsub.f32 %v2658_v5, %v2832_v53 }
 0xc3b   :  { %v2836_v60 = vrot.slane %v2834_v56, 7 }
 0xc3d   :  { %v2838_v4 = vmul.f32 %v5265_v35, %v2836_v60 }
 0xc3f   :  { %v2839_v7 = vadd.f32 %v5263_v57, %v2838_v4 }
 0xc41   :  { %v2841_v8 = vrot.slane %v2839_v7, 2 }
 0xc43   :  { %3999 = vmatmul.mubr.msk.f32.vlgmr.msra.gmra.mrb[26].mxu0 %vm428_vm10, %v2841_v8  ;;  %4485 = vmatmul.mubr.msk.f32.vlgmr.msra.gmra.mrb[30].mxu1 %vm428_vm10, %v2841_v8 }
 0xc44   :  { %5010 = vmatpush1.bf16.msra.mxu0 %v5849_v13  ;;  %5025 = vmatpush3.bf16.msra.mxu1 %v5851_v33 }
 0xc45   :  { %5012 = vmatprep.subr.bf16.mxu0 %v5855_v34  ;;  %5026 = vmatprep.subr.bf16.mxu1 %v5397_v1 }
 0xc46   :  { %3089 = vmatprep.mubr.f32.mxu0 %v5396_v0  ;;  %4503 = vmatprep.mubr.msk.f32.mxu1 %vm5398_vm0, %v5396_v0 }
 0xc48   :  { %5014 = vmatpush1.bf16.msra.mxu0 %v5863_v47  ;;  %5028 = vmatpush3.bf16.msra.mxu1 %v5865_v48 }
 0xc49   :  { %5016 = vmatprep.subr.bf16.mxu0 %v5869_v63  ;;  %5029 = vmatprep.subr.bf16.mxu1 %v5397_v1 }
 0xc4c   :  { %5018 = vmatpush1.bf16.msra.mxu0 %v5876_v61  ;;  %5031 = vmatpush3.bf16.msra.mxu1 %v5878_v62 }
 0xc4d   :  { %5020 = vmatprep.subr.bf16.mxu0 %v5882_v3  ;;  %5032 = vmatprep.subr.bf16.mxu1 %v5397_v1 }
 0xc50   :  { %5022 = vmatpush1.bf16.msra.mxu0 %v5886_v9  ;;  %5034 = vmatpush3.bf16.msra.mxu1 %v5888_v22 }
 0xc51   :  { %5036 = vmatprep.subr.bf16.mxu0 %v5845_v26  ;;  %5051 = vmatprep.subr.bf16.mxu1 %v5397_v1 }
 0xd16   :  { %v2910_v10 = vpop.f32.mrb[26].mxu0  ;;  %v2981_v11 = vpop.f32.mrb[30].mxu1 }
 0xd17   :  { %v2987_v31 = vrot.slane %v2910_v10, 5  ;;  %v2912_v14 = vpop.f32.mrb[27].mxu0  ;;  %v4486_v15 = vpop.f32.mrb[31].mxu1  ;;  %v3005_v49 = vadd.f32 %v2981_v11, %v5935_v28 }
 0xd18   :  { %v2988_v44 = vrot.slane %v2912_v14, 5 }
 0xd19   :  { %v2991_v38 = vadd.f32 %v2987_v31, %v5927_v46  ;;  %v3007_v55 = vrot.slane %v3005_v49, 5 }
 0xd1a   :  { %v2992_v20 = vadd.f32 %v2988_v44, %v5932_v39 }
 0xd1b   :  { %v4001_v16 = vmul.f32 -1.442695, %v2991_v38 }
 0xd1c   :  { %v4002_v45 = vmul.f32 -1.442695, %v2992_v20 }
 0xd1d   :  { %5266 = vpow2.f32 %v4001_v16 }
 0xd27   :  { %v5267_v24 = vpop.eup %5266 }
 0xd28   :  { %v2999_v40 = vadd.f32 1.0, %v5267_v24 }
 0xd2a   :  { %5268 = vrcp.f32 %v2999_v40 }
 0xd2b   :  { %5270 = vpow2.f32 %v4002_v45 }
 0xd34   :  { %v5269_v51 = vpop.eup %5268 }
 0xd35   :  { %v3009_v5 = vmul.f32 %v5269_v51, %v3007_v55  ;;  %v5271_v2 = vpop.eup %5270 }
 0xd36   :  { %v3000_v6 = vadd.f32 1.0, %v5271_v2 }
 0xd37   :  { %v3010_v21 = vadd.f32 %v3009_v5, %v5940_v54 }
 0xd39   :  { %5272 = vtanh.f32 %v3010_v21 }
 0xd3a   :  { %5274 = vrcp.f32 %v3000_v6 }
 0xd43   :  { %v5273_v25 = vpop.eup %5272 }
 0xd44   :  { %v3013_v27 = vrot.slane %v5273_v25, 1  ;;  %v5275_v29 = vpop.eup %5274 }
 0xd46   :  { %v3015_v59 = vsub.f32 %v2839_v7, %v3013_v27 }
 0xd48   :  { %v3017_v19 = vrot.slane %v3015_v59, 7 }
 0xd4a   :  { %v3019_v58 = vmul.f32 %v5275_v29, %v3017_v19 }
 0xd4c   :  { %v3020_v30 = vadd.f32 %v5273_v25, %v3019_v58 }
 0xd4e   :  { %v3022_v23 = vrot.slane %v3020_v30, 3 }
 0xd50   :  { %4003 = vmatmul.mubr.msk.f32.vlgmr.msra.gmra.mrb[28].mxu0 %vm428_vm10, %v3022_v23  ;;  %4504 = vmatmul.mubr.msk.f32.vlgmr.msra.gmra.mrb[32].mxu1 %vm428_vm10, %v3022_v23 }
 0xd51   :  { %5038 = vmatpush1.bf16.msra.mxu0 %v5849_v13  ;;  %5053 = vmatpush3.bf16.msra.mxu1 %v5851_v33 }
 0xd52   :  { %5040 = vmatprep.subr.bf16.mxu0 %v5855_v34  ;;  %5054 = vmatprep.subr.bf16.mxu1 %v5397_v1 }
 0xd53   :  { %3270 = vmatprep.mubr.f32.mxu0 %v5396_v0  ;;  %4522 = vmatprep.mubr.msk.f32.mxu1 %vm5398_vm0, %v5396_v0 }
 0xd55   :  { %5042 = vmatpush1.bf16.msra.mxu0 %v5863_v47  ;;  %5056 = vmatpush3.bf16.msra.mxu1 %v5865_v48 }
 0xd56   :  { %5044 = vmatprep.subr.bf16.mxu0 %v5869_v63  ;;  %5057 = vmatprep.subr.bf16.mxu1 %v5397_v1 }
 0xd59   :  { %5046 = vmatpush1.bf16.msra.mxu0 %v5876_v61  ;;  %5059 = vmatpush3.bf16.msra.mxu1 %v5878_v62 }
 0xd5a   :  { %5048 = vmatprep.subr.bf16.mxu0 %v5882_v3  ;;  %5060 = vmatprep.subr.bf16.mxu1 %v5397_v1 }
 0xd5d   :  { %5050 = vmatpush1.bf16.msra.mxu0 %v5886_v9  ;;  %5062 = vmatpush3.bf16.msra.mxu1 %v5888_v22 }
 0xd5e   :  { %5064 = vmatprep.subr.bf16.mxu0 %v5845_v26  ;;  %5079 = vmatprep.subr.bf16.mxu1 %v5397_v1 }
 0xe23   :  { %v3091_v36 = vpop.f32.mrb[28].mxu0  ;;  %v3162_v41 = vpop.f32.mrb[32].mxu1 }
 0xe24   :  { %v3168_v32 = vrot.slane %v3091_v36, 4  ;;  %v3093_v42 = vpop.f32.mrb[29].mxu0  ;;  %v4505_v17 = vpop.f32.mrb[33].mxu1  ;;  %v3186_v60 = vadd.f32 %v3162_v41, %v5935_v28 }
 0xe25   :  { %v3169_v18 = vrot.slane %v3093_v42, 4 }
 0xe26   :  { %v3172_v43 = vadd.f32 %v3168_v32, %v5927_v46  ;;  %v3188_v35 = vrot.slane %v3186_v60, 4 }
 0xe27   :  { %v3173_v37 = vadd.f32 %v3169_v18, %v5932_v39 }
 0xe28   :  { %v4005_v50 = vmul.f32 -1.442695, %v3172_v43 }
 0xe29   :  { %v4006_v56 = vmul.f32 -1.442695, %v3173_v37 }
 0xe2a   :  { %5276 = vpow2.f32 %v4005_v50 }
 0xe34   :  { %v5277_v57 = vpop.eup %5276 }
 0xe35   :  { %v3180_v53 = vadd.f32 1.0, %v5277_v57 }
 0xe37   :  { %5278 = vrcp.f32 %v3180_v53 }
 0xe38   :  { %5280 = vpow2.f32 %v4006_v56 }
 0xe41   :  { %v5279_v4 = vpop.eup %5278 }
 0xe42   :  { %v3190_v7 = vmul.f32 %v5279_v4, %v3188_v35  ;;  %v5281_v10 = vpop.eup %5280 }
 0xe43   :  { %v3181_v11 = vadd.f32 1.0, %v5281_v10 }
 0xe44   :  { %v3191_v8 = vadd.f32 %v3190_v7, %v5940_v54 }
 0xe46   :  { %5282 = vtanh.f32 %v3191_v8 }
 0xe47   :  { %5284 = vrcp.f32 %v3181_v11 }
 0xe50   :  { %v5283_v31 = vpop.eup %5282 }
 0xe51   :  { %v3194_v14 = vrot.slane %v5283_v31, 1  ;;  %v5285_v16 = vpop.eup %5284 }
 0xe53   :  { %v3196_v15 = vsub.f32 %v3020_v30, %v3194_v14 }
 0xe55   :  { %v3198_v38 = vrot.slane %v3196_v15, 7 }
 0xe57   :  { %v3200_v44 = vmul.f32 %v5285_v16, %v3198_v38 }
 0xe59   :  { %v3201_v20 = vadd.f32 %v5283_v31, %v3200_v44 }
 0xe5b   :  { %v3203_v24 = vrot.slane %v3201_v20, 4 }
 0xe5d   :  { %4007 = vmatmul.mubr.msk.f32.vlgmr.msra.gmra.mrb[30].mxu0 %vm428_vm10, %v3203_v24  ;;  %4523 = vmatmul.mubr.msk.f32.vlgmr.msra.gmra.mrb[34].mxu1 %vm428_vm10, %v3203_v24  ;;  %v3749_v24 = vld [vmem:[#allocation5 + $0x3d8] sm:$0xff] }
 0xe5e   :  { %5066 = vmatpush1.bf16.msra.mxu0 %v5849_v13  ;;  %5081 = vmatpush3.bf16.msra.mxu1 %v5851_v33 }
 0xe5f   :  { %5068 = vmatprep.subr.bf16.mxu0 %v5855_v34  ;;  %5082 = vmatprep.subr.bf16.mxu1 %v5397_v1 }
 0xe60   :  { %3451 = vmatprep.mubr.f32.mxu0 %v5396_v0  ;;  %4541 = vmatprep.mubr.msk.f32.mxu1 %vm5398_vm0, %v5396_v0 }
 0xe62   :  { %5070 = vmatpush1.bf16.msra.mxu0 %v5863_v47  ;;  %5084 = vmatpush3.bf16.msra.mxu1 %v5865_v48 }
 0xe63   :  { %5072 = vmatprep.subr.bf16.mxu0 %v5869_v63  ;;  %5085 = vmatprep.subr.bf16.mxu1 %v5397_v1 }
 0xe66   :  { %5074 = vmatpush1.bf16.msra.mxu0 %v5876_v61  ;;  %5087 = vmatpush3.bf16.msra.mxu1 %v5878_v62 }
 0xe67   :  { %5076 = vmatprep.subr.bf16.mxu0 %v5882_v3  ;;  %5088 = vmatprep.subr.bf16.mxu1 %v5397_v1 }
 0xe6a   :  { %5078 = vmatpush1.bf16.msra.mxu0 %v5886_v9  ;;  %5090 = vmatpush3.bf16.msra.mxu1 %v5888_v22 }
 0xe6b   :  { %5092 = vmatprep.subr.bf16.mxu0 %v5845_v26  ;;  %5107 = vmatprep.subr.bf16.mxu1 %v5397_v1 }
 0xf30   :  { %v3272_v40 = vpop.f32.mrb[30].mxu0  ;;  %v3343_v45 = vpop.f32.mrb[34].mxu1 }
 0xf31   :  { %v3349_v49 = vrot.slane %v3272_v40, 3  ;;  %v3274_v55 = vpop.f32.mrb[31].mxu0  ;;  %v4524_v51 = vpop.f32.mrb[35].mxu1  ;;  %v3367_v26 = vadd.f32 %v3343_v45, %v5935_v28  ;;  %v3750_v45 = vld [vmem:[#allocation5 + $0x3f0] sm:$0xff] }
 0xf32   :  { %v3350_v2 = vrot.slane %v3274_v55, 3  ;;  %v3752_v51 = vld [vmem:[#allocation5 + $0x420] sm:$0xff] }
 0xf33   :  { %v3353_v5 = vadd.f32 %v3349_v49, %v5927_v46  ;;  %v3369_v19 = vrot.slane %v3367_v26, 3  ;;  %v3751_v49 = vld [vmem:[#allocation5 + $0x408] sm:$0xff] }
 0xf34   :  { %v3354_v6 = vadd.f32 %v3350_v2, %v5932_v39  ;;  %v5123_v55 = vpack.c.bf16 %v3751_v49, %v3750_v45  ;;  %v3754_v2 = vld [vmem:[#allocation5 + $0x450] sm:$0xff] }
 0xf35   :  { %v4009_v21 = vmul.f32 -1.442695, %v3353_v5  ;;  %v3753_v5 = vld [vmem:[#allocation5 + $0x438] sm:$0xff] }
 0xf36   :  { %v4010_v59 = vmul.f32 -1.442695, %v3354_v6  ;;  %v3755_v6 = vld [vmem:[#allocation5 + $0x468] sm:$0xff] }
 0xf37   :  { %5286 = vpow2.f32 %v4009_v21  ;;  %v5126_v21 = vpack.c.bf16 %v3753_v5, %v3752_v51 }
 0xf41   :  { %v5287_v25 = vpop.eup %5286 }
 0xf42   :  { %v3361_v27 = vadd.f32 1.0, %v5287_v25  ;;  %v3757_v25 = vld [vmem:[#allocation5 + $0x498] sm:$0xff] }
 0xf44   :  { %5288 = vrcp.f32 %v3361_v27  ;;  %v3758_v27 = vld [vmem:[#allocation5 + $0x4b0] sm:$0xff] }
 0xf45   :  { %5290 = vpow2.f32 %v4010_v59  ;;  %v3759_v59 = vld [vmem:[#allocation5 + $0x4c8] sm:$0xff]  ;;  %v5132_v26 = vpack.c.bf16 %v3758_v27, %v3757_v25 }
 0xf4e   :  { %v5289_v29 = vpop.eup %5288 }
 0xf4f   :  { %v3371_v58 = vmul.f32 %v5289_v29, %v3369_v19  ;;  %v5291_v23 = vpop.eup %5290  ;;  %v3760_v19 = vld [vmem:[#allocation5 + $0x4e0] sm:$0xff] }
 0xf50   :  { %v3362_v36 = vadd.f32 1.0, %v5291_v23  ;;  %v5135_v29 = vpack.c.bf16 %v3760_v19, %v3759_v59 }
 0xf51   :  { %v3372_v30 = vadd.f32 %v3371_v58, %v5940_v54  ;;  %v3761_v58 = vld [vmem:[#allocation5 + $0x4f8] sm:$0xff] }
 0xf53   :  { %5292 = vtanh.f32 %v3372_v30  ;;  %v3762_v30 = vld [vmem:[#allocation5 + $0x510] sm:$0xff] }
 0xf54   :  { %5294 = vrcp.f32 %v3362_v36  ;;  %v5138_v23 = vpack.c.bf16 %v3762_v30, %v3761_v58 }
 0xf5d   :  { %v5293_v41 = vpop.eup %5292 }
 0xf5e   :  { %v3375_v32 = vrot.slane %v5293_v41, 1  ;;  %v5295_v43 = vpop.eup %5294 }
 0xf60   :  { %v3377_v42 = vsub.f32 %v3201_v20, %v3375_v32  ;;  %v3748_v20 = vld [vmem:[#allocation5 + $0x3c0] sm:$0xff] }
 0xf61   :  { %v5120_v40 = vpack.c.bf16 %v3749_v24, %v3748_v20 }
 0xf62   :  { %v3379_v17 = vrot.slane %v3377_v42, 7 }
 0xf64   :  { %v3381_v50 = vmul.f32 %v5295_v43, %v3379_v17 }
 0xf66   :  { %v3382_v18 = vadd.f32 %v5293_v41, %v3381_v50 }
 0xf68   :  { %v3384_v37 = vrot.slane %v3382_v18, 5 }
 0xf6a   :  { %4011 = vmatmul.mubr.msk.f32.vlgmr.msra.gmra.mrb[32].mxu0 %vm428_vm10, %v3384_v37  ;;  %4542 = vmatmul.mubr.msk.f32.vlgmr.msra.gmra.mrb[36].mxu1 %vm428_vm10, %v3384_v37 }
 0xf6b   :  { %5094 = vmatpush1.bf16.msra.mxu0 %v5849_v13  ;;  %5109 = vmatpush3.bf16.msra.mxu1 %v5851_v33 }
 0xf6c   :  { %5096 = vmatprep.subr.bf16.mxu0 %v5855_v34  ;;  %5110 = vmatprep.subr.bf16.mxu1 %v5397_v1 }
 0xf6d   :  { %3632 = vmatprep.mubr.f32.mxu0 %v5396_v0  ;;  %4560 = vmatprep.mubr.msk.f32.mxu1 %vm5398_vm0, %v5396_v0 }
 0xf6f   :  { %5098 = vmatpush1.bf16.msra.mxu0 %v5863_v47  ;;  %5112 = vmatpush3.bf16.msra.mxu1 %v5865_v48 }
 0xf70   :  { %5100 = vmatprep.subr.bf16.mxu0 %v5869_v63  ;;  %5113 = vmatprep.subr.bf16.mxu1 %v5397_v1 }
 0xf73   :  { %5102 = vmatpush1.bf16.msra.mxu0 %v5876_v61  ;;  %5115 = vmatpush3.bf16.msra.mxu1 %v5878_v62 }
 0xf74   :  { %5104 = vmatprep.subr.bf16.mxu0 %v5882_v3  ;;  %5116 = vmatprep.subr.bf16.mxu1 %v5397_v1 }
 0xf77   :  { %5106 = vmatpush1.bf16.msra.mxu0 %v5886_v9  ;;  %5118 = vmatpush3.bf16.msra.mxu1 %v5888_v22 }
 0xf78   :  { %5119 = vmatprep.subr.bf16.mxu0 %v5397_v1  ;;  %5131 = vmatprep.subr.bf16.mxu1 %v5397_v1 }
0x103d   :  { %v3453_v13 = vpop.f32.mrb[32].mxu0  ;;  %v3524_v33 = vpop.f32.mrb[36].mxu1 }
0x103e   :  { %v3530_v34 = vrot.slane %v3453_v13, 2  ;;  %v3455_v47 = vpop.f32.mrb[33].mxu0  ;;  %v4543_v48 = vpop.f32.mrb[37].mxu1  ;;  %v3548_v53 = vadd.f32 %v3524_v33, %v5935_v28 }
0x103f   :  { %v3531_v62 = vrot.slane %v3455_v47, 2 }
0x1040   :  { %v3534_v63 = vadd.f32 %v3530_v34, %v5927_v46  ;;  %v3550_v56 = vrot.slane %v3548_v53, 2 }
0x1041   :  { %v3535_v3 = vadd.f32 %v3531_v62, %v5932_v39 }
0x1042   :  { %v4013_v61 = vmul.f32 -1.442695, %v3534_v63 }
0x1043   :  { %v4014_v22 = vmul.f32 -1.442695, %v3535_v3 }
0x1044   :  { %5296 = vpow2.f32 %v4013_v61 }
0x104e   :  { %v5297_v57 = vpop.eup %5296 }
0x104f   :  { %v3542_v9 = vadd.f32 1.0, %v5297_v57 }
0x1051   :  { %5298 = vrcp.f32 %v3542_v9 }
0x1052   :  { %5300 = vpow2.f32 %v4014_v22 }
0x105b   :  { %v5299_v60 = vpop.eup %5298 }
0x105c   :  { %v3552_v35 = vmul.f32 %v5299_v60, %v3550_v56  ;;  %v5301_v7 = vpop.eup %5300  ;;  %v3745_v60 = vrot.slane %v5944_v52, 1 }
0x105d   :  { %v3543_v8 = vadd.f32 1.0, %v5301_v7 }
0x105e   :  { %v3553_v4 = vadd.f32 %v3552_v35, %v5940_v54 }
0x1060   :  { %5302 = vtanh.f32 %v3553_v4  ;;  %v3764_v4 = vld [vmem:[#allocation5 + $0x540] sm:$0xff] }
0x1061   :  { %5304 = vrcp.f32 %v3543_v8  ;;  %v3756_v8 = vld [vmem:[#allocation5 + $0x480] ss:$0 sm:$0xff] }
0x106a   :  { %v5303_v10 = vpop.eup %5302 }
0x106b   :  { %v3556_v11 = vrot.slane %v5303_v10, 1  ;;  %v5305_v15 = vpop.eup %5304 }
0x106d   :  { %v3558_v31 = vsub.f32 %v3382_v18, %v3556_v11 }
0x106f   :  { %v3560_v14 = vrot.slane %v3558_v31, 7 }
0x1071   :  { %v3562_v38 = vmul.f32 %v5305_v15, %v3560_v14  ;;  %v3765_v15 = vld [vmem:[#allocation5 + $0x558] ss:$0 sm:$0xff] }
0x1073   :  { %v6099_v16 = vadd.f32 %v5303_v10, %v3562_v38 }
0x1075   :  { %v3565_v44 = vrot.slane %v6099_v16, 6 }
0x1077   :  { %4015 = vmatmul.mubr.msk.f32.vlgmr.msra.gmra.mrb[34].mxu0 %vm428_vm10, %v3565_v44  ;;  %4561 = vmatmul.mubr.msk.f32.vlgmr.msra.gmra.mrb[38].mxu1 %vm428_vm10, %v3565_v44 }
0x1078   :  { %4579 = vmatprep.mubr.msk.f32.mxu0 %vm5398_vm0, %v5396_v0  ;;  %4598 = vmatprep.mubr.msk.f32.mxu1 %vm5398_vm0, %v5396_v0  ;;  %v5129_v0 = vpack.c.bf16 %v3755_v6, %v3754_v2 }
0x1079   :  { %5121 = vmatpush3.bf16.msra.mxu0 %v5120_v40  ;;  %5133 = vmatpush3.bf16.msra.mxu1 %v5132_v26 }
0x107a   :  { %5122 = vmatprep.subr.bf16.mxu0 %v5397_v1  ;;  %5134 = vmatprep.subr.bf16.mxu1 %v5397_v1 }
0x107d   :  { %5124 = vmatpush3.bf16.msra.mxu0 %v5123_v55  ;;  %5136 = vmatpush3.bf16.msra.mxu1 %v5135_v29 }
0x107e   :  { %5125 = vmatprep.subr.bf16.mxu0 %v5397_v1  ;;  %5137 = vmatprep.subr.bf16.mxu1 %v5397_v1 }
0x1081   :  { %5127 = vmatpush3.bf16.msra.mxu0 %v5126_v21  ;;  %5139 = vmatpush3.bf16.msra.mxu1 %v5138_v23 }
0x1082   :  { %5128 = vmatprep.subr.bf16.mxu0 %v5397_v1  ;;  %5140 = vmatprep.subr.bf16.mxu1 %v5397_v1 }
0x1085   :  { %5130 = vmatpush3.bf16.msra.mxu0 %v5129_v0 }
0x114a   :  { %v3634_v36 = vpop.f32.mrb[34].mxu0  ;;  %v3705_v41 = vpop.f32.mrb[38].mxu1 }
0x114b   :  { %v3711_v32 = vrot.slane %v3634_v36, 1  ;;  %v3636_v42 = vpop.f32.mrb[35].mxu0  ;;  %v4562_v17 = vpop.f32.mrb[39].mxu1  ;;  %v3729_v47 = vadd.f32 %v3705_v41, %v5935_v28 }
0x114c   :  { %v3712_v18 = vrot.slane %v3636_v42, 1 }
0x114d   :  { %v3715_v43 = vadd.f32 %v3711_v32, %v5927_v46  ;;  %v3731_v1 = vrot.slane %v3729_v47, 1 }
0x114e   :  { %v3716_v37 = vadd.f32 %v3712_v18, %v5932_v39 }
0x114f   :  { %v4017_v50 = vmul.f32 -1.442695, %v3715_v43 }
0x1150   :  { %v4018_v34 = vmul.f32 -1.442695, %v3716_v37 }
0x1151   :  { %5306 = vpow2.f32 %v4017_v50 }
0x115b   :  { %v5307_v13 = vpop.eup %5306 }
0x115c   :  { %v3723_v33 = vadd.f32 1.0, %v5307_v13 }
0x115e   :  { %5308 = vrcp.f32 %v3723_v33 }
0x115f   :  { %5310 = vpow2.f32 %v4018_v34 }
0x1168   :  { %v5309_v48 = vpop.eup %5308 }
0x1169   :  { %v3733_v63 = vmul.f32 %v5309_v48, %v3731_v1  ;;  %v5311_v62 = vpop.eup %5310 }
0x116a   :  { %v3724_v46 = vadd.f32 1.0, %v5311_v62 }
0x116b   :  { %v3734_v61 = vadd.f32 %v3733_v63, %v5940_v54  ;;  %v3763_v54 = vld [vmem:[#allocation5 + $0x528] sm:$0xff] }
0x116c   :  { %v5141_v7 = vpack.c.bf16 %v3764_v4, %v3763_v54 }
0x116d   :  { %5312 = vtanh.f32 %v3734_v61 }
0x116e   :  { %5314 = vrcp.f32 %v3724_v46  ;;  %5142 = vmatpush3.bf16.msra.mxu1 %v5141_v7 }
0x1177   :  { %v5313_v3 = vpop.eup %5312 }
0x1178   :  { %v3737_v57 = vrot.slane %v5313_v3, 1  ;;  %v5315_v22 = vpop.eup %5314 }
0x117a   :  { %v3739_v39 = vsub.f32 %v6099_v16, %v3737_v57 }
0x117c   :  { %v3741_v9 = vrot.slane %v3739_v39, 7 }
0x117e   :  { %v3743_v53 = vmul.f32 %v5315_v22, %v3741_v9 }
0x1180   :  { %v3744_v56 = vadd.f32 %v5313_v3, %v3743_v53 }
0x1182   :  { %v3747_v28 = vsel %vm48_vm11, %v3744_v56, %v3745_v60 }
0x1183   :  { %v3767_v35 = vrot.slane %v3747_v28, 7 }
0x1185   :  { %4580 = vmatmul.mubr.msk.f32.vlgmr.msra.gmra.mrb[36].mxu0 %vm428_vm10, %v3767_v35 }
0x1258   :  { %v3836_v10 = vpop.f32.mrb[36].mxu0 }
0x1259   :  { %v3837_v11 = vadd.f32 %v3836_v10, %v3756_v8  ;;  %v4581_v31 = vpop.f32.mrb[37].mxu0 }
0x125b   :  { %v3840_v14 = vmax.f32 %v3837_v11, 0.0 }
0x125d   :  { %4599 = vmatmul.mubr.msk.f32.vlgmr.msra.gmra.mrb[40].mxu1 %vm428_vm10, %v3840_v14 }
0x1330   :  { %v3910_v38 = vpop.f32.mrb[40].mxu1 }
0x1331   :  { %v3911_v52 = vadd.f32 %v3910_v38, %v3765_v15  ;;  %v4600_v16 = vpop.f32.mrb[41].mxu1 }
0x1333   :  { %v3914_v12 = vmax.f32 %v3911_v52, 0.0 }
0x1335   :  { %v3916_v44 = vsel %vm3915_vm12, %v3914_v12, -inf }
0x1336   :  { %3917 = vmax.xlane.f32.xlu1 %v3916_v44 }
0x13c3   :  { %v3918_v20 = vpop.xlane.xlu1 %3917 }
0x13c4   :  { %v3919_v24 = vsub.f32 %v3914_v12, %v3918_v20 }
0x13c6   :  { %v3920_v40 = vmul.f32 1.442695, %v3919_v24 }
0x13c8   :  { %5316 = vpow2.f32 %v3920_v40 }
0x13d2   :  { %v5317_v45 = vpop.eup %5316 }
0x13d3   :  { %v3922_v49 = vsel %vm3915_vm12, %v5317_v45, 0.0 }
0x13d4   :  { %3923 = vadd.xlane.f32.xlu1 %v3922_v49 }
0x1461   :  { %v3924_v55 = vpop.xlane.xlu1 %3923 }
0x1462   :  { %5318 = vlog2.f32 %v3924_v55 }
0x146c   :  { %v5319_v51 = vpop.eup %5318 }
0x146d   :  { %v3926_v5 = vmul.f32 0.6931472, %v5319_v51 }
0x146f   :  { %v3927_v21 = vsub.f32 %v3919_v24, %v3926_v5 }
0x1471   :  { %3928 = vst.msk [vmem:[#allocation7] sm:$0x1] %vm3915_vm12, %v3927_v21 }
0x1472   :  { %5375 = shalt.err (!%p5372_p6)
}
0x1473   :  { %s5376_s23 = scalar_lea.hbm %s6142_s3, 16 }
0x1474   :  { %p5377_p7 = scmp.ne.s32.totalorder %s6142_s3, %s5376_s23  ;;  %p5380_p8 = scmp.lt.u32.totalorder %s5376_s23, %s6142_s3 }
0x1476   :  { %p5382_p9 = pnand %p5380_p8, %p5377_p7 }
0x1478   :  { %5385 = shalt.err (!%p5382_p9)
}
0x1479   :  { %3938 = dma.vmem_to_hbm [thread:$0]  %s3936_s18, 16, %s6142_s3, [#allocation4]  }
0x147a   :  { %5390 = dma.done.wait [#allocation4], 16  }
0x147b   :  { %5391 = vsyncadd [#allocation4], 4294967280 }
0x147c   :  { %3942 = vsyncpa [#allocation3], 1 }
0x147d   :  { %3943 = vsyncpa [#allocation6], 1 }
0x147e   :  { %3944 = vsyncpa [#allocation4], 1 }

</bundles_post_ra>
